<compile_context>
chip_gen: v7x
topology: tpu7x:2x2x1
jax: 0.10.0
libtpu: 0.0.40
codegen_flags: <defaults>
</compile_context>

<pallas_src>
import functools

import jax
import jax.numpy as jnp
import numpy as np
from jax import lax
from jax.experimental import pallas as pl
from jax.experimental.pallas import tpu as pltpu

# Pinned matmul precision, used identically by the kernel and the reference.
_MXU_PRECISION = lax.Precision.HIGHEST


def _ensemble_kernel(x_ref, w_ref, b_ref, out_ref, *, num_members, d_out):
    # One fused forward pass for all M members on this row block:
    #   (tb, D_in) @ (D_in, M*D_out) + (1, M*D_out)
    y = jnp.dot(
        x_ref[...], w_ref[...],
        preferred_element_type=jnp.float32,
        precision=_MXU_PRECISION,
    ) + b_ref[...]

    # Mean over the M members via static 128-aligned lane slices (free vreg
    # selection; no reshape / transposed reduce through the XLU).
    acc = y[:, 0:d_out]
    for k in range(1, num_members):
        acc = acc + y[:, k * d_out:(k + 1) * d_out]
    mean = acc * jnp.float32(1.0 / num_members)

    # Two-pass unbiased variance (matches torch.std default, ddof=1).
    ssq = jnp.zeros_like(mean)
    for k in range(num_members):
        c = y[:, k * d_out:(k + 1) * d_out] - mean
        ssq = ssq + c * c
    if num_members > 1:
        std = jnp.sqrt(ssq * jnp.float32(1.0 / (num_members - 1)))  # EUP sqrt
    else:
        # torch.std with a single member (ddof=1) yields NaN.
        std = jnp.full_like(ssq, jnp.nan)

    # Fused lane-dense store: [mean | std] -> one (tb, 2*D_out) unmasked store.
    out_ref[...] = jnp.concatenate([mean, std], axis=-1).astype(out_ref.dtype)


def prepare_ensemble_params(w_stack, b_stack):
    """One-time re-layout (call at model init, NOT per forward).

    Column block k of W_flat / b_flat corresponds to ensemble member k.
    w_stack: (M, D_in, D_out); b_stack: (M, 1, D_out).
    """
    M, D_in, D_out = w_stack.shape
    w_flat = jnp.transpose(w_stack, (1, 0, 2)).reshape(D_in, M * D_out)
    b_flat = b_stack.reshape(1, M * D_out)
    return w_flat, b_flat


@functools.partial(jax.jit, static_argnames=("num_members",))
def ensemble_forward(x, w_flat, b_flat, *, num_members):
    """x: (B, D_in); w_flat: (D_in, M*D_out); b_flat: (1, M*D_out)."""
    B, D_in = x.shape
    N = w_flat.shape[1]
    D_out = N // num_members

    # Row-block tiling over the batch: grid axis is "parallel" (2 TCs on v7x,
    # pipeline overlap on v5e/v6e once there are >=2 blocks).
    tb = 128 if B % 128 == 0 else B
    grid = (B // tb,)

    kernel = functools.partial(
        _ensemble_kernel, num_members=num_members, d_out=D_out)

    cost = pl.CostEstimate(
        flops=2 * B * D_in * N + 4 * B * N,          # matmul + epilogue
        transcendentals=B * D_out,                   # sqrt
        bytes_accessed=4 * (B * D_in + D_in * N + N + 2 * B * D_out),
    )

    fused = pl.pallas_call(
        kernel,
        out_shape=jax.ShapeDtypeStruct((B, 2 * D_out), x.dtype),
        grid_spec=pltpu.PrefetchScalarGridSpec(
            num_scalar_prefetch=0,
            grid=grid,
            in_specs=[
                pl.BlockSpec((tb, D_in), lambda i: (i, 0)),   # x row block
                pl.BlockSpec((D_in, N), lambda i: (0, 0)),    # W_flat (resident)
                pl.BlockSpec((1, N), lambda i: (0, 0)),       # b_flat (resident)
            ],
            out_specs=pl.BlockSpec((tb, 2 * D_out), lambda i: (i, 0)),
        ),
        compiler_params=pltpu.CompilerParams(
            dimension_semantics=("parallel",),
            vmem_limit_bytes=32 * 1024 * 1024,       # explicit, safe on all gens
        ),
        cost_estimate=cost,
    )(x, w_flat, b_flat)

    # Split the fused [mean | std] output (fused with the kernel under jit).
    return fused[:, :D_out], fused[:, D_out:]


def ensemble_reference(x, w_stack, b_stack):
    outs = jnp.einsum("bi,mio->mbo", x, w_stack,
                      precision=_MXU_PRECISION) + b_stack     # (M, B, D_out)
    mean = jnp.mean(outs, axis=0)
    std = jnp.std(outs, axis=0, ddof=1)                       # torch.std: unbiased
    return mean, std


if __name__ == "__main__":
    # Shapes consistent with the forward pass; B grown to amortize launch/DMA
    # latency per the perf review (row blocks of 128, 2 grid steps).
    M = 4          # number of ensemble members
    B = 256        # batch (2 row blocks of 128)
    D_in = 32      # input features
    D_out = 128    # output features per member (lane-dense)

    key = jax.random.PRNGKey(0)
    kx, kw, kb = jax.random.split(key, 3)

    x = jax.random.normal(kx, (B, D_in), dtype=jnp.float32)
    # Deterministic synthetic parameters for the M Linear members.
    w_stack = jax.random.normal(kw, (M, D_in, D_out), dtype=jnp.float32) * 0.05
    b_stack = jax.random.normal(kb, (M, 1, D_out), dtype=jnp.float32) * 0.05

    # One-time parameter re-layout ("model init"), outside the forward path.
    w_flat, b_flat = prepare_ensemble_params(w_stack, b_stack)

    mean, std = jax.block_until_ready(
        ensemble_forward(x, w_flat, b_flat, num_members=M))

    mean_ref, std_ref = ensemble_reference(x, w_stack, b_stack)
    np.testing.assert_allclose(np.asarray(mean), np.asarray(mean_ref),
                               rtol=1e-5, atol=1e-5)
    np.testing.assert_allclose(np.asarray(std), np.asarray(std_ref),
                               rtol=1e-5, atol=1e-5)

    print("KERNEL_OK")
</pallas_src>

<mosaic_0001>
module attributes {stable_mosaic.version = 11 : i64} {
  func.func @_ensemble_kernel(%arg0: i32, %arg1: memref<128x32xf32, #tpu.memory_space<vmem>>, %arg2: memref<32x512xf32, #tpu.memory_space<vmem>>, %arg3: memref<1x512xf32, #tpu.memory_space<vmem>>, %arg4: memref<128x256xf32, #tpu.memory_space<vmem>>) attributes {dimension_semantics = [#tpu.dimension_semantics<parallel>], iteration_bounds = array<i64: 2>, scalar_prefetch = 0 : i64, scratch_operands = 0 : i64, tpu.core_type = #tpu.core_type<tc>, window_params = [{transform_indices = @transform_0, window_bounds = array<i64: 128, 32>}, {pipeline_mode = #tpu.pipeline_mode<synchronous>, transform_indices = @transform_1, window_bounds = array<i64: 32, 512>}, {pipeline_mode = #tpu.pipeline_mode<synchronous>, transform_indices = @transform_2, window_bounds = array<i64: 1, 512>}, {transform_indices = @transform_3, window_bounds = array<i64: 128, 256>}]} {
    %c0 = arith.constant 0 : index
    %c0_0 = arith.constant 0 : index
    %0 = vector.load %arg1[%c0, %c0_0] : memref<128x32xf32, #tpu.memory_space<vmem>>, vector<128x32xf32>
    %c0_1 = arith.constant 0 : index
    %c0_2 = arith.constant 0 : index
    %1 = vector.load %arg2[%c0_1, %c0_2] : memref<32x512xf32, #tpu.memory_space<vmem>>, vector<32x512xf32>
    %cst = arith.constant dense<0.000000e+00> : vector<128x512xf32>
    %2 = tpu.matmul %0, %1, %cst {dimension_numbers = #tpu.dot_dimension_numbers<[1], [0], [0], [1], [0, 0, 1, 1], [], []>, precision = #tpu.contract_precision<fp32>} : vector<128x32xf32>, vector<32x512xf32>, vector<128x512xf32> -> vector<128x512xf32>
    %c0_3 = arith.constant 0 : index
    %c0_4 = arith.constant 0 : index
    %3 = vector.load %arg3[%c0_3, %c0_4] : memref<1x512xf32, #tpu.memory_space<vmem>>, vector<1x512xf32>
    %4 = vector.broadcast %3 : vector<1x512xf32> to vector<128x512xf32>
    %5 = arith.addf %2, %4 : vector<128x512xf32>
    %6 = vector.extract_strided_slice %5 {offsets = [0, 0], sizes = [128, 128], strides = [1, 1]} : vector<128x512xf32> to vector<128x128xf32>
    %7 = vector.extract_strided_slice %5 {offsets = [0, 128], sizes = [128, 128], strides = [1, 1]} : vector<128x512xf32> to vector<128x128xf32>
    %8 = arith.addf %6, %7 : vector<128x128xf32>
    %9 = vector.extract_strided_slice %5 {offsets = [0, 256], sizes = [128, 128], strides = [1, 1]} : vector<128x512xf32> to vector<128x128xf32>
    %10 = arith.addf %8, %9 : vector<128x128xf32>
    %11 = vector.extract_strided_slice %5 {offsets = [0, 384], sizes = [128, 128], strides = [1, 1]} : vector<128x512xf32> to vector<128x128xf32>
    %12 = arith.addf %10, %11 : vector<128x128xf32>
    %cst_5 = arith.constant 2.500000e-01 : f32
    %13 = vector.broadcast %cst_5 : f32 to vector<128x128xf32>
    %14 = arith.mulf %12, %13 : vector<128x128xf32>
    %cst_6 = arith.constant 0.000000e+00 : f32
    %15 = vector.broadcast %cst_6 : f32 to vector<128x128xf32>
    %16 = vector.extract_strided_slice %5 {offsets = [0, 0], sizes = [128, 128], strides = [1, 1]} : vector<128x512xf32> to vector<128x128xf32>
    %17 = arith.subf %16, %14 : vector<128x128xf32>
    %18 = arith.mulf %17, %17 : vector<128x128xf32>
    %19 = arith.addf %15, %18 : vector<128x128xf32>
    %20 = vector.extract_strided_slice %5 {offsets = [0, 128], sizes = [128, 128], strides = [1, 1]} : vector<128x512xf32> to vector<128x128xf32>
    %21 = arith.subf %20, %14 : vector<128x128xf32>
    %22 = arith.mulf %21, %21 : vector<128x128xf32>
    %23 = arith.addf %19, %22 : vector<128x128xf32>
    %24 = vector.extract_strided_slice %5 {offsets = [0, 256], sizes = [128, 128], strides = [1, 1]} : vector<128x512xf32> to vector<128x128xf32>
    %25 = arith.subf %24, %14 : vector<128x128xf32>
    %26 = arith.mulf %25, %25 : vector<128x128xf32>
    %27 = arith.addf %23, %26 : vector<128x128xf32>
    %28 = vector.extract_strided_slice %5 {offsets = [0, 384], sizes = [128, 128], strides = [1, 1]} : vector<128x512xf32> to vector<128x128xf32>
    %29 = arith.subf %28, %14 : vector<128x128xf32>
    %30 = arith.mulf %29, %29 : vector<128x128xf32>
    %31 = arith.addf %27, %30 : vector<128x128xf32>
    %cst_7 = arith.constant 0.333333343 : f32
    %32 = vector.broadcast %cst_7 : f32 to vector<128x128xf32>
    %33 = arith.mulf %31, %32 : vector<128x128xf32>
    %34 = math.sqrt %33 : vector<128x128xf32>
    %35 = tpu.concatenate %14, %34 in 1 : vector<128x128xf32>, vector<128x128xf32> -> vector<128x256xf32>
    %c0_8 = arith.constant 0 : index
    %c0_9 = arith.constant 0 : index
    %36 = vector.load %arg4[%c0_8, %c0_9] : memref<128x256xf32, #tpu.memory_space<vmem>>, vector<128x256xf32>
    tpu.vector_store %arg4[%c0_8, %c0_9], %35 {strides = array<i32>} : memref<128x256xf32, #tpu.memory_space<vmem>>, vector<128x256xf32>,
    return
  }
  func.func @transform_0(%arg0: i32) -> (i32, i32) {
    %c0_i32 = arith.constant 0 : i32
    %c0_i32_0 = arith.constant 0 : i32
    return %arg0, %c0_i32 : i32, i32
  }
  func.func @transform_1(%arg0: i32) -> (i32, i32) {
    %c0_i32 = arith.constant 0 : i32
    %c0_i32_0 = arith.constant 0 : i32
    %c0_i32_1 = arith.constant 0 : i32
    return %c0_i32, %c0_i32_0 : i32, i32
  }
  func.func @transform_2(%arg0: i32) -> (i32, i32) {
    %c0_i32 = arith.constant 0 : i32
    %c0_i32_0 = arith.constant 0 : i32
    %c0_i32_1 = arith.constant 0 : i32
    return %c0_i32, %c0_i32_0 : i32, i32
  }
  func.func @transform_3(%arg0: i32) -> (i32, i32) {
    %c0_i32 = arith.constant 0 : i32
    %c0_i32_0 = arith.constant 0 : i32
    return %arg0, %c0_i32 : i32, i32
  }
}

</mosaic_0001>

<bundles_post_ra>
// kernel: ensemble_forward.1
= control target key start
LH: loop header
LB: loop body
LE: loop exit
PB: predicated region body
PF: predicated region fallthrough
CT: control target
= control target key end

     0   :  { %s3872_s12 = smov 0   ;;  %s5151_s0 = inlined_call_operand.vmem [shape: f32[256,32], index: 0, kind: input, shape index: {}]   ;;  %s5152_s1 = inlined_call_operand.vmem [shape: f32[32,512], index: 1, kind: input, shape index: {}]   ;;  %s5153_s2 = inlined_call_operand.vmem [shape: f32[1,512], index: 2, kind: input, shape index: {}]   ;;  %s5154_s3 = inlined_call_operand.vmem [shape: f32[256,256], index: 3, kind: output, shape index: {}]  }
   0x1 LB: > { %s3309_s13 = sadd.s32 4294967295, %s3849_s12   ;;  %p3313_p0 = scmp.ge.s32.totalorder %s3849_s12, 1  ;;  %s3849_s12 = sphi %s3872_s12, %s13_s12  }
   0x2   : > { %p138_p1 = scmp.lt.s32.totalorder %s3849_s12, 3 }
   0x4   : > { %p139_p2 = pnand %p3313_p0, %p138_p1 }
   0x6   : > { %142 = sbr.rel (%p139_p2) target bundleno = 704 (0x2c0), region = 32 }
   0xd   : > { %v193_v0 = vld [vmem:[%s5152_s1 + $0x8] sm:$0xff]  ;;  %v192_v2 = vld [vmem:[%s5152_s1] sm:$0xff]  ;;  %s3314_s20 = sshll.u32 %s3309_s13, 4  ;;  %v195_v7 = vld [vmem:[%s5152_s1 + $0x18] sm:$0xff]  ;;  %v5166_v9 = vmov 0.0   ;;  %vm230_vm0 = vcmask 261120  }
   0xe   : > { %v197_v1 = vld [vmem:[%s5152_s1 + $0x28] sm:$0xff]  ;;  %v279_v3 = vand.u32 4294901760, %v193_v0  ;;  %v196_v5 = vld [vmem:[%s5152_s1 + $0x20] sm:$0xff]  ;;  %v281_v6 = vand.u32 4294901760, %v192_v2  ;;  %v199_v8 = vld [vmem:[%s5152_s1 + $0x38] sm:$0xff]  ;;  %351 = vmatprep.mubr.f32.mxu0 %v5166_v9  ;;  %1629 = vmatprep.mubr.f32.mxu1 %v5166_v9  ;;  %v1557_v11 = vand.u32 4294901760, %v195_v7 }
   0xf   : > { %v283_v4 = vand.u32 4294901760, %v197_v1  ;;  %v285_v10 = vand.u32 4294901760, %v196_v5  ;;  %v1561_v12 = vand.u32 4294901760, %v199_v8  ;;  %v194_v13 = vld [vmem:[%s5152_s1 + $0x10] sm:$0xff]  ;;  %v201_v15 = vld [vmem:[%s5152_s1 + $0x48] sm:$0xff]  ;;  %v3919_v18 = vld [vmem:[%s5152_s1 + $0x40] sm:$0xff] }
  0x10   : > { %v198_v14 = vld [vmem:[%s5152_s1 + $0x30] sm:$0xff]  ;;  %v3914_v17 = vld [vmem:[%s5152_s1 + $0x68] sm:$0xff]  ;;  %v3924_v19 = vld [vmem:[%s5152_s1 + $0x60] sm:$0xff]  ;;  %p164_p3 = scmp.lt.s32.totalorder %s3314_s20, 31  ;;  %v3936_v23 = vsub.f32 %v193_v0, %v279_v3  ;;  %v1559_v24 = vand.u32 4294901760, %v194_v13  ;;  %v287_v26 = vand.u32 4294901760, %v201_v15  ;;  %v3957_v33 = vsub.f32 %v192_v2, %v281_v6 }
  0x11   : > { %v3909_v16 = vpack.c.bf16 %v283_v4, %v279_v3  ;;  %v3926_v20 = vpack.c.bf16 %v285_v10, %v281_v6  ;;  %v3928_v21 = vpack.c.bf16 %v1561_v12, %v1557_v11  ;;  %v3933_v22 = vld [vmem:[%s5152_s1 + $0x58] sm:$0xff]  ;;  %v1563_v25 = vand.u32 4294901760, %v198_v14  ;;  %v3955_v32 = vld [vmem:[%s5152_s1 + $0x50] sm:$0xff] }
  0x12   : > { %s5253_s20 = smov (!%p164_p3, %s3314_s20), 31  ;;  %v3940_v27 = vsub.f32 %v197_v1, %v283_v4  ;;  %v291_v28 = vand.u32 4294901760, %v3914_v17  ;;  %v289_v29 = vand.u32 4294901760, %v3919_v18  ;;  %v293_v30 = vand.u32 4294901760, %v3924_v19  ;;  %v3950_v31 = vld [vmem:[%s5152_s1 + $0x78] sm:$0xff]  ;;  %v3965_v36 = vld [vmem:[%s5152_s1 + $0x70] sm:$0xff] }
  0x13   : > { %3323 = vmatprep.subr.bf16.mxu0 %v3909_v16  ;;  %3371 = vmatprep.subr.bf16.mxu1 %v3928_v21  ;;  %v3959_v34 = vpack.c.bf16 %v1563_v25, %v1559_v24  ;;  %v1565_v35 = vand.u32 4294901760, %v3933_v22  ;;  %s3315_s22 = sshll.u32 %s5253_s20, 3  ;;  %v3968_v37 = vsub.f32 %v196_v5, %v285_v10  ;;  %v3970_v38 = vsub.f32 %v195_v7, %v1557_v11  ;;  %s3321_s28 = sshll.u32 %s5253_s20, 4 }
  0x14   : > { %3325 = vmatpush1.bf16.msra.mxu0 %v3926_v20  ;;  %v3974_v39 = vpack.c.bf16 %v291_v28, %v287_v26  ;;  %v3980_v40 = vpack.c.bf16 %v293_v30, %v289_v29  ;;  %s3985_s25 = scalar_lea.vmem %s5151_s0, %s3315_s22  ;;  %v3987_v41 = vsub.f32 %v199_v8, %v1561_v12  ;;  %v3990_v42 = vsub.f32 %v194_v13, %v1559_v24  ;;  %s4752_s4 = scalar_lea.vmem %s5154_s3, %s3321_s28 }
  0x15   : > { %3373 = vmatpush1.bf16.msra.mxu1 %v3959_v34  ;;  %v1569_v43 = vand.u32 4294901760, %v3950_v31  ;;  %v1567_v44 = vand.u32 4294901760, %v3955_v32  ;;  %v176_v45 = vld [vmem:[%s3985_s25] sm:$0xff]  ;;  %v1571_v46 = vand.u32 4294901760, %v3965_v36  ;;  %v5165_v47 = vand.u32 4294901760, %v3936_v23  ;;  %v177_v5 = vld [vmem:[%s3985_s25 + $0x8] sm:$0xff] }
  0x16   : > { %3327 = vmatprep.subr.bf16.mxu0 %v3974_v39  ;;  %v5164_v48 = vand.u32 4294901760, %v3940_v27  ;;  %v232_v49 = vsel %vm230_vm0, %v176_v45, 0  ;;  %v4000_v50 = vsub.f32 %v198_v14, %v1563_v25  ;;  %v4011_v53 = vsub.f32 %v201_v15, %v287_v26  ;;  %v178_v11 = vld [vmem:[%s3985_s25 + $0x10] sm:$0xff]  ;;  %v179_v24 = vld [vmem:[%s3985_s25 + $0x18] sm:$0xff] }
  0x17   : > { %v4007_v51 = vpack.c.bf16 %v1569_v43, %v1565_v35  ;;  %v4009_v52 = vand.u32 4294901760, %v232_v49  ;;  %v4017_v54 = vpack.c.bf16 %v1571_v46, %v1567_v44  ;;  %v531_v55 = vsub.f32 %v3936_v23, %v5165_v47 }
  0x18   : > { %3329 = vmatpush1.bf16.msra.mxu0 %v3980_v40  ;;  %v543_v56 = vsub.f32 %v3940_v27, %v5164_v48  ;;  %v5159_v58 = vand.u32 4294901760, %v3957_v33  ;;  %v5157_v59 = vand.u32 4294901760, %v3968_v37  ;;  %v5162_v60 = vand.u32 4294901760, %v3970_v38 }
  0x19   : > { %3375 = vmatprep.subr.bf16.mxu1 %v4007_v51  ;;  %v4027_v57 = vsub.f32 %v232_v49, %v4009_v52  ;;  %v532_v61 = vand.u32 4294901760, %v531_v55  ;;  %v5160_v63 = vand.u32 4294901760, %v3987_v41  ;;  %v5155_v0 = vand.u32 4294901760, %v3990_v42  ;;  %v180_v55 = vld [vmem:[%s3985_s25 + $0x20] sm:$0xff] }
  0x1a   : > { %3377 = vmatpush1.bf16.msra.mxu1 %v4017_v54  ;;  %v544_v62 = vand.u32 4294901760, %v543_v56  ;;  %v537_v2 = vsub.f32 %v3957_v33, %v5159_v58  ;;  %v549_v3 = vsub.f32 %v3968_v37, %v5157_v59  ;;  %v1809_v4 = vsub.f32 %v3970_v38, %v5162_v60  ;;  %v181_v56 = vld [vmem:[%s3985_s25 + $0x28] sm:$0xff] }
  0x1b   : > { %v4036_v1 = vand.u32 4294901760, %v4027_v57  ;;  %v1821_v7 = vsub.f32 %v3987_v41, %v5160_v63  ;;  %v1815_v8 = vsub.f32 %v3990_v42, %v5155_v0  ;;  %v5156_v10 = vand.u32 4294901760, %v4000_v50 }
  0x1c   : > { %v3330_v6 = vpack.c.bf16 %v544_v62, %v532_v61  ;;  %v538_v13 = vand.u32 4294901760, %v537_v2  ;;  %v550_v14 = vand.u32 4294901760, %v549_v3  ;;  %v1810_v15 = vand.u32 4294901760, %v1809_v4 }
  0x1d   : > { %5203 = vst [vmem:[#allocation2_spill] sm:$0xff] %v4036_v1  ;;  %v355_v12 = vsub.f32 %v4027_v57, %v4036_v1  ;;  %v1822_v25 = vand.u32 4294901760, %v1821_v7  ;;  %v1816_v26 = vand.u32 4294901760, %v1815_v8  ;;  %v1827_v45 = vsub.f32 %v4000_v50, %v5156_v10  ;;  %v182_v8 = vld [vmem:[%s3985_s25 + $0x30] sm:$0xff] }
  0x1e   : > { %3331 = vmatprep.subr.bf16.mxu0 %v3330_v6  ;;  %v235_v49 = vsel %vm230_vm0, %v177_v5, 0  ;;  %v3332_v62 = vpack.c.bf16 %v550_v14, %v538_v13  ;;  %v238_v2 = vsel %vm230_vm0, %v178_v11, 0  ;;  %v241_v7 = vsel %vm230_vm0, %v179_v24, 0  ;;  %v183_v14 = vld [vmem:[%s3985_s25 + $0x38] sm:$0xff] }
  0x1f   : > { %v356_v61 = vand.u32 4294901760, %v355_v12  ;;  %v4065_v0 = vand.u32 4294901760, %v235_v49  ;;  %v3378_v3 = vpack.c.bf16 %v1822_v25, %v1810_v15  ;;  %v1828_v4 = vand.u32 4294901760, %v1827_v45 }
  0x20   : > { %v4068_v6 = vand.u32 4294901760, %v238_v2  ;;  %v4075_v10 = vand.u32 4294901760, %v241_v7  ;;  %v244_v12 = vsel %vm230_vm0, %v180_v55, 0  ;;  %v247_v13 = vsel %vm230_vm0, %v181_v56, 0 }
  0x21   : > { %357 = vmatmul.mubr.f32.vlgmr.msra.gmra.mrb[0].mxu0 %v356_v61  ;;  %1635 = vmatmul.mubr.f32.vlgmr.msra.gmra.mrb[0].mxu1 %v356_v61  ;;  %v4073_v5 = vsub.f32 %v235_v49, %v4065_v0  ;;  %v3380_v11 = vpack.c.bf16 %v1828_v4, %v1816_v26  ;;  %v4083_v24 = vand.u32 4294901760, %v244_v12  ;;  %v4085_v25 = vand.u32 4294901760, %v247_v13 }
  0x22   : > { %3333 = vmatpush1.bf16.msra.mxu0 %v3332_v62  ;;  %3379 = vmatprep.subr.bf16.mxu1 %v3378_v3  ;;  %v4081_v15 = vsub.f32 %v238_v2, %v4068_v6  ;;  %v4093_v49 = vsub.f32 %v241_v7, %v4075_v10  ;;  %v250_v55 = vsel %vm230_vm0, %v182_v8, 0  ;;  %v4099_v26 = vsub.f32 %v3914_v17, %v291_v28 }
  0x23   : > { %362 = vmatprep.mubr.f32.mxu0 %v5166_v9  ;;  %1640 = vmatprep.mubr.f32.mxu1 %v5166_v9  ;;  %v4090_v45 = vand.u32 4294901760, %v4073_v5  ;;  %v253_v61 = vsel %vm230_vm0, %v183_v14, 0  ;;  %v4111_v3 = vsub.f32 %v244_v12, %v4083_v24  ;;  %v5158_v4 = vand.u32 4294901760, %v4011_v53 }
  0x24   : > { %3381 = vmatpush1.bf16.msra.mxu1 %v3380_v11  ;;  %v4102_v56 = vand.u32 4294901760, %v4081_v15  ;;  %v4108_v2 = vand.u32 4294901760, %v4093_v49  ;;  %v4117_v28 = vsub.f32 %v247_v13, %v4085_v25  ;;  %v4119_v7 = vand.u32 4294901760, %v250_v55 }
  0x25   : > { %5204 = vst [vmem:[#allocation3_spill] sm:$0xff] %v4090_v45  ;;  %v366_v62 = vsub.f32 %v4073_v5, %v4090_v45  ;;  %v4124_v8 = vsub.f32 %v3919_v18, %v289_v29  ;;  %v4126_v11 = vand.u32 4294901760, %v253_v61  ;;  %v555_v12 = vsub.f32 %v4011_v53, %v5158_v4 }
  0x26   : > { %5205 = vst [vmem:[#allocation4_spill] sm:$0xff] %v4102_v56  ;;  %5206 = vst [vmem:[#allocation5_spill] sm:$0xff] %v4108_v2  ;;  %v377_v17 = vsub.f32 %v4081_v15, %v4102_v56  ;;  %v4134_v59 = vsub.f32 %v3924_v19, %v293_v30  ;;  %v4139_v13 = vsub.f32 %v3933_v22, %v1565_v35  ;;  %v4149_v4 = vand.u32 4294901760, %v4111_v3  ;;  %v184_v30 = vld [vmem:[%s3985_s25 + $0x40] sm:$0xff]  ;;  %v186_v56 = vld [vmem:[%s3985_s25 + $0x50] sm:$0xff] }
  0x27   : > { %v367_v14 = vand.u32 4294901760, %v366_v62  ;;  %v4144_v18 = vsub.f32 %v3950_v31, %v1569_v43  ;;  %v388_v62 = vsub.f32 %v4093_v49, %v4108_v2  ;;  %v5161_v19 = vand.u32 4294901760, %v4099_v26 }
  0x28   : > { %v378_v29 = vand.u32 4294901760, %v377_v17  ;;  %5207 = vst [vmem:[#allocation6_spill] sm:$0xff] %v4149_v4  ;;  %v4156_v22 = vsub.f32 %v3955_v32, %v1567_v44  ;;  %v4161_v31 = vsub.f32 %v3965_v36, %v1571_v46  ;;  %v4166_v35 = vand.u32 4294901760, %v4117_v28 }
  0x29   : > { %368 = vmatmul.mubr.f32.gmra.mrb[2].mxu0 %v367_v14  ;;  %1646 = vmatmul.mubr.f32.gmra.mrb[2].mxu1 %v367_v14  ;;  %v4169_v43 = vsub.f32 %v250_v55, %v4119_v7  ;;  %v4172_v17 = vsub.f32 %v253_v61, %v4126_v11  ;;  %v556_v32 = vand.u32 4294901760, %v555_v12  ;;  %v567_v44 = vsub.f32 %v4099_v26, %v5161_v19 }
  0x2a   : > { %373 = vmatprep.mubr.f32.mxu0 %v5166_v9  ;;  %1651 = vmatprep.mubr.f32.mxu1 %v5166_v9  ;;  %5208 = vst [vmem:[#allocation7_spill] sm:$0xff] %v4166_v35  ;;  %v5163_v36 = vand.u32 4294901760, %v4124_v8  ;;  %v256_v46 = vsel %vm230_vm0, %v184_v30, 0  ;;  %v5172_v14 = vand.u32 4294901760, %v4134_v59  ;;  %v5173_v58 = vand.u32 4294901760, %v4139_v13 }
  0x2b   : > { %v5174_v63 = vand.u32 4294901760, %v4144_v18  ;;  %v389_v55 = vand.u32 4294901760, %v388_v62  ;;  %v399_v61 = vsub.f32 %v4111_v3, %v4149_v4  ;;  %v568_v12 = vand.u32 4294901760, %v567_v44 }
  0x2c   : > { %v561_v19 = vsub.f32 %v4124_v8, %v5163_v36  ;;  %v573_v30 = vsub.f32 %v4134_v59, %v5172_v14  ;;  %v5175_v44 = vand.u32 4294901760, %v4156_v22  ;;  %v4199_v36 = vand.u32 4294901760, %v256_v46 }
  0x2d   : > { %379 = vmatmul.mubr.f32.gmra.mrb[4].mxu0 %v378_v29  ;;  %1657 = vmatmul.mubr.f32.gmra.mrb[4].mxu1 %v378_v29  ;;  %v1833_v29 = vsub.f32 %v4139_v13, %v5173_v58  ;;  %v1845_v62 = vsub.f32 %v4144_v18, %v5174_v63  ;;  %v3334_v60 = vpack.c.bf16 %v568_v12, %v556_v32  ;;  %v5184_v47 = vand.u32 4294901760, %v4161_v31 }
  0x2e   : > { %384 = vmatprep.mubr.f32.mxu0 %v5166_v9  ;;  %1662 = vmatprep.mubr.f32.mxu1 %v5166_v9  ;;  %v562_v48 = vand.u32 4294901760, %v561_v19  ;;  %v185_v9 = vld [vmem:[%s3985_s25 + $0x48] sm:$0xff]  ;;  %v574_v4 = vand.u32 4294901760, %v573_v30  ;;  %v1839_v58 = vsub.f32 %v4156_v22, %v5175_v44  ;;  %v400_v63 = vand.u32 4294901760, %v399_v61 }
  0x2f   : > { %v1834_v2 = vand.u32 4294901760, %v1833_v29  ;;  %v1846_v14 = vand.u32 4294901760, %v1845_v62  ;;  %v410_v32 = vsub.f32 %v4117_v28, %v4166_v35  ;;  %v4209_v19 = vand.u32 4294901760, %v4169_v43  ;;  %3335 = vmatprep.subr.bf16.mxu0 %v3334_v60  ;;  %v191_v35 = vld [vmem:[%s3985_s25 + $0x78] sm:$0xff] }
  0x30   : > { %v1851_v12 = vsub.f32 %v4161_v31, %v5184_v47  ;;  %v5210_v30 = vmov 0.0   ;;  %v3336_v29 = vpack.c.bf16 %v574_v4, %v562_v48  ;;  %v1840_v44 = vand.u32 4294901760, %v1839_v58 }
  0x31   : > { %390 = vmatmul.mubr.f32.gmra.mrb[6].mxu0 %v389_v55  ;;  %1668 = vmatmul.mubr.f32.gmra.mrb[6].mxu1 %v389_v55  ;;  %5209 = vst [vmem:[#allocation8_spill] sm:$0xff] %v4209_v19  ;;  %v3382_v62 = vpack.c.bf16 %v1846_v14, %v1834_v2  ;;  %v259_v55 = vsel %vm230_vm0, %v185_v9, 0  ;;  %v4220_v45 = vand.u32 4294901760, %v4172_v17  ;;  %v4223_v1 = vsub.f32 %v256_v46, %v4199_v36  ;;  %v187_v46 = vld [vmem:[%s3985_s25 + $0x58] sm:$0xff] }
  0x32   : > { %395 = vmatprep.mubr.f32.mxu0 %v5210_v30  ;;  %1673 = vmatprep.mubr.f32.mxu1 %v5210_v30  ;;  %v1852_v61 = vand.u32 4294901760, %v1851_v12  ;;  %v411_v48 = vand.u32 4294901760, %v410_v32  ;;  %v421_v58 = vsub.f32 %v4169_v43, %v4209_v19  ;;  %v4227_v60 = vand.u32 4294901760, %v259_v55 }
  0x33   : > { %5211 = vst [vmem:[#allocation9_spill] sm:$0xff] %v4220_v45  ;;  %3337 = vmatpush1.bf16.msra.mxu0 %v3336_v29  ;;  %3383 = vmatprep.subr.bf16.mxu1 %v3382_v62  ;;  %v262_v2 = vsel %vm230_vm0, %v186_v56, 0  ;;  %v4233_v4 = vsel %vm230_vm0, %v191_v35, 0  ;;  %v3338_v14 = vpack.c.bf16 %v3940_v27, %v3936_v23  ;;  %v432_v32 = vsub.f32 %v4172_v17, %v4220_v45  ;;  %v188_v62 = vld [vmem:[%s3985_s25 + $0x60] sm:$0xff] }
  0x34   : > { %v3384_v9 = vpack.c.bf16 %v1852_v61, %v1840_v44  ;;  %v422_v44 = vand.u32 4294901760, %v421_v58  ;;  %v4244_v56 = vsub.f32 %v259_v55, %v4227_v60  ;;  %v4246_v12 = vand.u32 4294901760, %v262_v2 }
  0x35   : > { %401 = vmatmul.mubr.f32.gmra.mrb[8].mxu0 %v400_v63  ;;  %1679 = vmatmul.mubr.f32.gmra.mrb[8].mxu1 %v400_v63  ;;  %v4237_v63 = vand.u32 4294901760, %v4223_v1  ;;  %v265_v35 = vsel %vm230_vm0, %v187_v46, 0  ;;  %v3386_v55 = vpack.c.bf16 %v3987_v41, %v3970_v38  ;;  %v433_v58 = vand.u32 4294901760, %v432_v32 }
  0x36   : > { %406 = vmatprep.mubr.f32.mxu0 %v5210_v30  ;;  %1684 = vmatprep.mubr.f32.mxu1 %v5210_v30  ;;  %v4264_v46 = vsub.f32 %v262_v2, %v4246_v12  ;;  %v4266_v47 = vand.u32 4294901760, %v265_v35  ;;  %v268_v29 = vsel %vm230_vm0, %v188_v62, 0  ;;  %v190_v62 = vld [vmem:[%s3985_s25 + $0x70] sm:$0xff] }
  0x37   : > { %3385 = vmatpush1.bf16.msra.mxu1 %v3384_v9  ;;  %5212 = vst [vmem:[#allocation10_spill] sm:$0xff] %v4237_v63  ;;  %3339 = vmatprep.subr.bf16.mxu0 %v3338_v14  ;;  %v443_v61 = vsub.f32 %v4223_v1, %v4237_v63  ;;  %v4261_v9 = vand.u32 4294901760, %v4244_v56  ;;  %v189_v14 = vld [vmem:[%s3985_s25 + $0x68] sm:$0xff]  ;;  %v4281_v45 = vand.u32 4294901760, %v268_v29 }
  0x38   : > { %3387 = vmatprep.subr.bf16.mxu1 %v3386_v55  ;;  %v4276_v32 = vand.u32 4294901760, %v4264_v46  ;;  %v4279_v63 = vsub.f32 %v265_v35, %v4266_v47 }
  0x39   : > { %412 = vmatmul.mubr.f32.gmra.mrb[10].mxu0 %v411_v48  ;;  %1690 = vmatmul.mubr.f32.gmra.mrb[10].mxu1 %v411_v48  ;;  %5213 = vst [vmem:[#allocation11_spill] sm:$0xff] %v4261_v9  ;;  %v444_v48 = vand.u32 4294901760, %v443_v61  ;;  %v454_v2 = vsub.f32 %v4244_v56, %v4261_v9  ;;  %v4294_v35 = vsub.f32 %v268_v29, %v4281_v45  ;;  %v274_v9 = vsel %vm230_vm0, %v190_v62, 0 }
  0x3a   : > { %417 = vmatprep.mubr.f32.mxu0 %v5210_v30  ;;  %1695 = vmatprep.mubr.f32.mxu1 %v5210_v30  ;;  %5214 = vst [vmem:[#allocation12_spill] sm:$0xff] %v4276_v32  ;;  %5215 = vst [vmem:[#allocation13_spill] sm:$0xff] %v4279_v63  ;;  %v4307_v29 = vand.u32 4294901760, %v274_v9  ;;  %v4312_v62 = vand.u32 4294901760, %v4233_v4 }
  0x3b   : > { %v455_v55 = vand.u32 4294901760, %v454_v2 }
  0x3d   : > { %423 = vmatmul.mubr.f32.gmra.mrb[12].mxu0 %v422_v44  ;;  %1701 = vmatmul.mubr.f32.gmra.mrb[12].mxu1 %v422_v44  ;;  %v271_v44 = vsel %vm230_vm0, %v189_v14, 0  ;;  %v4291_v14 = vand.u32 4294901760, %v4279_v63 }
  0x3e   : > { %428 = vmatprep.mubr.f32.mxu0 %v5210_v30  ;;  %1706 = vmatprep.mubr.f32.mxu1 %v5210_v30  ;;  %v4286_v61 = vand.u32 4294901760, %v271_v44 }
  0x3f   : > { %5216 = vst [vmem:[#allocation14_spill] sm:$0xff] %v4291_v14  ;;  %v476_v2 = vsub.f32 %v4279_v63, %v4291_v14  ;;  %v4320_v14 = vsub.f32 %v274_v9, %v4307_v29 }
  0x40   : > { %v4300_v19 = vsub.f32 %v271_v44, %v4286_v61 }
  0x41   : > { %434 = vmatmul.mubr.f32.gmra.mrb[14].mxu0 %v433_v58  ;;  %1712 = vmatmul.mubr.f32.gmra.mrb[14].mxu1 %v433_v58  ;;  %v465_v58 = vsub.f32 %v4264_v46, %v4276_v32  ;;  %v4305_v32 = vand.u32 4294901760, %v4294_v35  ;;  %v477_v44 = vand.u32 4294901760, %v476_v2  ;;  %v4327_v2 = vand.u32 4294901760, %v4320_v14 }
  0x42   : > { %439 = vmatprep.mubr.f32.mxu0 %v5210_v30  ;;  %1717 = vmatprep.mubr.f32.mxu1 %v5210_v30 }
  0x43   : > { %5217 = vst [vmem:[#allocation15_spill] sm:$0xff] %v4305_v32 }
  0x45   : > { %445 = vmatmul.mubr.f32.gmra.mrb[16].mxu0 %v444_v48  ;;  %1723 = vmatmul.mubr.f32.gmra.mrb[16].mxu1 %v444_v48  ;;  %v466_v48 = vand.u32 4294901760, %v465_v58  ;;  %v4317_v58 = vand.u32 4294901760, %v4300_v19 }
  0x46   : > { %450 = vmatprep.mubr.f32.mxu0 %v5210_v30  ;;  %1728 = vmatprep.mubr.f32.mxu1 %v5210_v30 }
  0x47   : > { %5218 = vst [vmem:[#allocation16_spill] sm:$0xff] %v4317_v58 }
  0x49   : > { %456 = vmatmul.mubr.f32.gmra.mrb[18].mxu0 %v455_v55  ;;  %1734 = vmatmul.mubr.f32.gmra.mrb[18].mxu1 %v455_v55  ;;  %v487_v55 = vsub.f32 %v4294_v35, %v4305_v32  ;;  %v4331_v32 = vsub.f32 %v4233_v4, %v4312_v62 }
  0x4a   : > { %461 = vmatprep.mubr.f32.mxu0 %v5210_v30  ;;  %1739 = vmatprep.mubr.f32.mxu1 %v5210_v30 }
  0x4b   : > { %v488_v63 = vand.u32 4294901760, %v487_v55  ;;  %v4338_v55 = vand.u32 4294901760, %v4331_v32 }
  0x4d   : > { %467 = vmatmul.mubr.f32.gmra.mrb[20].mxu0 %v466_v48  ;;  %1745 = vmatmul.mubr.f32.gmra.mrb[20].mxu1 %v466_v48  ;;  %v498_v48 = vsub.f32 %v4300_v19, %v4317_v58  ;;  %v520_v58 = vsub.f32 %v4331_v32, %v4338_v55 }
  0x4e   : > { %472 = vmatprep.mubr.f32.mxu0 %v5210_v30  ;;  %1750 = vmatprep.mubr.f32.mxu1 %v5210_v30 }
  0x4f   : > { %v499_v9 = vand.u32 4294901760, %v498_v48  ;;  %v3342_v48 = vpack.c.bf16 %v4099_v26, %v4011_v53 }
  0x51   : > { %478 = vmatmul.mubr.f32.gmra.mrb[22].mxu0 %v477_v44  ;;  %1756 = vmatmul.mubr.f32.gmra.mrb[22].mxu1 %v477_v44  ;;  %v509_v44 = vsub.f32 %v4320_v14, %v4327_v2 }
  0x52   : > { %483 = vmatprep.mubr.f32.mxu0 %v5210_v30  ;;  %1761 = vmatprep.mubr.f32.mxu1 %v5210_v30 }
  0x53   : > { %v510_v4 = vand.u32 4294901760, %v509_v44  ;;  %v5220_v44 = vpack.c.bf16 %v4000_v50, %v3990_v42 }
  0x55   : > { %489 = vmatmul.mubr.f32.gmra.mrb[24].mxu0 %v488_v63  ;;  %1767 = vmatmul.mubr.f32.gmra.mrb[24].mxu1 %v488_v63  ;;  %v521_v63 = vand.u32 4294901760, %v520_v58  ;;  %v5219_v58 = vpack.c.bf16 %v3968_v37, %v3957_v33 }
  0x56   : > { %494 = vmatprep.mubr.f32.mxu0 %v5210_v30  ;;  %1772 = vmatprep.mubr.f32.mxu1 %v5210_v30 }
  0x59   : > { %500 = vmatmul.mubr.f32.gmra.mrb[26].mxu0 %v499_v9  ;;  %1778 = vmatmul.mubr.f32.gmra.mrb[26].mxu1 %v499_v9  ;;  %v3390_v9 = vpack.c.bf16 %v4144_v18, %v4139_v13 }
  0x5a   : > { %505 = vmatprep.mubr.f32.mxu0 %v5210_v30  ;;  %1783 = vmatprep.mubr.f32.mxu1 %v5210_v30 }
  0x5d   : > { %511 = vmatmul.mubr.f32.gmra.mrb[28].mxu0 %v510_v4  ;;  %1789 = vmatmul.mubr.f32.gmra.mrb[28].mxu1 %v510_v4  ;;  %v3344_v4 = vpack.c.bf16 %v4134_v59, %v4124_v8 }
  0x5e   : > { %516 = vmatprep.mubr.f32.mxu0 %v5210_v30  ;;  %1794 = vmatprep.mubr.f32.mxu1 %v5210_v30 }
  0x61   : > { %522 = vmatmul.mubr.f32.gmra.mrb[30].mxu0 %v521_v63  ;;  %1800 = vmatmul.mubr.f32.gmra.mrb[30].mxu1 %v521_v63  ;;  %v3392_v63 = vpack.c.bf16 %v4161_v31, %v4156_v22 }
  0x62   : > { %632 = vmatprep.mubr.f32.mxu0 %v5210_v30  ;;  %1910 = vmatprep.mubr.f32.mxu1 %v5210_v30 }
  0x65   : > { %634 = vmatmul.mubr.f32.vlgmr.msra.gmra.mrb[0].mxu0 %v4009_v52  ;;  %1912 = vmatmul.mubr.f32.vlgmr.msra.gmra.mrb[0].mxu1 %v4009_v52 }
  0x66   : > { %3341 = vmatpush1.bf16.msra.mxu0 %v5219_v58  ;;  %639 = vmatprep.mubr.f32.mxu0 %v5210_v30 }
  0x67   : > { %1917 = vmatprep.mubr.f32.mxu1 %v5210_v30  ;;  %3389 = vmatpush1.bf16.msra.mxu1 %v5220_v44  ;;  %v5223_v44 = vand.u32 4294901760, %v3970_v38  ;;  %v5227_v38 = vand.u32 4294901760, %v3968_v37  ;;  %v5236_v37 = vand.u32 4294901760, %v4134_v59  ;;  %v5240_v59 = vld [vmem:[#allocation4_spill] sm:$0xff] }
  0x68   : > { %3343 = vmatprep.subr.bf16.mxu0 %v3342_v48  ;;  %3391 = vmatprep.subr.bf16.mxu1 %v3390_v9  ;;  %v5221_v48 = vand.u32 4294901760, %v3936_v23  ;;  %v5222_v9 = vand.u32 4294901760, %v3940_v27  ;;  %v5225_v23 = vld [vmem:[#allocation13_spill] sm:$0xff]  ;;  %v5226_v27 = vand.u32 4294901760, %v3957_v33  ;;  %v5235_v33 = vand.u32 4294901760, %v4124_v8 }
  0x69   : > { %641 = vmatmul.mubr.f32.gmra.mrb[2].mxu0 %v4065_v0  ;;  %1919 = vmatmul.mubr.f32.gmra.mrb[2].mxu1 %v4065_v0  ;;  %v5241_v8 = vld [vmem:[#allocation5_spill] sm:$0xff] }
  0x6a   : > { %646 = vmatprep.mubr.f32.mxu0 %v5210_v30  ;;  %1924 = vmatprep.mubr.f32.mxu1 %v5210_v30  ;;  %v3354_v58 = vpack.c.bf16 %v5222_v9, %v5221_v48 }
  0x6b   : > { %3345 = vmatpush1.bf16.msra.mxu0 %v3344_v4  ;;  %3393 = vmatpush1.bf16.msra.mxu1 %v3392_v63  ;;  %v5251_v63 = vld [vmem:[#allocation16_spill] sm:$0xff] }
  0x6c   : > { %3347 = vmatprep.subr.bf16.mxu0 %v3909_v16  ;;  %3395 = vmatprep.subr.bf16.mxu1 %v3928_v21 }
  0x6d   : > { %648 = vmatmul.mubr.f32.gmra.mrb[4].mxu0 %v4068_v6  ;;  %1926 = vmatmul.mubr.f32.gmra.mrb[4].mxu1 %v4068_v6 }
  0x6e   : > { %653 = vmatprep.mubr.f32.mxu0 %v5210_v30  ;;  %1931 = vmatprep.mubr.f32.mxu1 %v5210_v30 }
  0x71   : > { %655 = vmatmul.mubr.f32.gmra.mrb[6].mxu0 %v4075_v10  ;;  %1933 = vmatmul.mubr.f32.gmra.mrb[6].mxu1 %v4075_v10 }
  0x72   : > { %660 = vmatprep.mubr.f32.mxu0 %v5210_v30  ;;  %1938 = vmatprep.mubr.f32.mxu1 %v5210_v30 }
  0x75   : > { %662 = vmatmul.mubr.f32.gmra.mrb[8].mxu0 %v4083_v24  ;;  %1940 = vmatmul.mubr.f32.gmra.mrb[8].mxu1 %v4083_v24 }
  0x76   : > { %667 = vmatprep.mubr.f32.mxu0 %v5210_v30  ;;  %1945 = vmatprep.mubr.f32.mxu1 %v5210_v30 }
  0x79   : > { %669 = vmatmul.mubr.f32.gmra.mrb[10].mxu0 %v4085_v25  ;;  %1947 = vmatmul.mubr.f32.gmra.mrb[10].mxu1 %v4085_v25 }
  0x7a   : > { %674 = vmatprep.mubr.f32.mxu0 %v5210_v30  ;;  %1952 = vmatprep.mubr.f32.mxu1 %v5210_v30 }
  0x7d   : > { %676 = vmatmul.mubr.f32.gmra.mrb[12].mxu0 %v4119_v7  ;;  %1954 = vmatmul.mubr.f32.gmra.mrb[12].mxu1 %v4119_v7 }
  0x7e   : > { %681 = vmatprep.mubr.f32.mxu0 %v5210_v30  ;;  %1959 = vmatprep.mubr.f32.mxu1 %v5210_v30 }
  0x81   : > { %683 = vmatmul.mubr.f32.gmra.mrb[14].mxu0 %v4126_v11  ;;  %1961 = vmatmul.mubr.f32.gmra.mrb[14].mxu1 %v4126_v11 }
  0x82   : > { %688 = vmatprep.mubr.f32.mxu0 %v5210_v30  ;;  %1966 = vmatprep.mubr.f32.mxu1 %v5210_v30 }
  0x85   : > { %690 = vmatmul.mubr.f32.gmra.mrb[16].mxu0 %v4199_v36  ;;  %1968 = vmatmul.mubr.f32.gmra.mrb[16].mxu1 %v4199_v36 }
  0x86   : > { %695 = vmatprep.mubr.f32.mxu0 %v5210_v30  ;;  %1973 = vmatprep.mubr.f32.mxu1 %v5210_v30 }
  0x89   : > { %697 = vmatmul.mubr.f32.gmra.mrb[18].mxu0 %v4227_v60  ;;  %1975 = vmatmul.mubr.f32.gmra.mrb[18].mxu1 %v4227_v60 }
  0x8a   : > { %702 = vmatprep.mubr.f32.mxu0 %v5210_v30  ;;  %1980 = vmatprep.mubr.f32.mxu1 %v5210_v30 }
  0x8d   : > { %704 = vmatmul.mubr.f32.gmra.mrb[20].mxu0 %v4246_v12  ;;  %1982 = vmatmul.mubr.f32.gmra.mrb[20].mxu1 %v4246_v12 }
  0x8e   : > { %709 = vmatprep.mubr.f32.mxu0 %v5210_v30  ;;  %1987 = vmatprep.mubr.f32.mxu1 %v5210_v30 }
  0x91   : > { %711 = vmatmul.mubr.f32.gmra.mrb[22].mxu0 %v4266_v47  ;;  %1989 = vmatmul.mubr.f32.gmra.mrb[22].mxu1 %v4266_v47 }
  0x92   : > { %716 = vmatprep.mubr.f32.mxu0 %v5210_v30  ;;  %1994 = vmatprep.mubr.f32.mxu1 %v5210_v30 }
  0x95   : > { %718 = vmatmul.mubr.f32.gmra.mrb[24].mxu0 %v4281_v45  ;;  %1996 = vmatmul.mubr.f32.gmra.mrb[24].mxu1 %v4281_v45 }
  0x96   : > { %723 = vmatprep.mubr.f32.mxu0 %v5210_v30  ;;  %2001 = vmatprep.mubr.f32.mxu1 %v5210_v30 }
  0x99   : > { %725 = vmatmul.mubr.f32.gmra.mrb[26].mxu0 %v4286_v61  ;;  %2003 = vmatmul.mubr.f32.gmra.mrb[26].mxu1 %v4286_v61 }
  0x9a   : > { %730 = vmatprep.mubr.f32.mxu0 %v5210_v30  ;;  %2008 = vmatprep.mubr.f32.mxu1 %v5210_v30 }
  0x9d   : > { %732 = vmatmul.mubr.f32.gmra.mrb[28].mxu0 %v4307_v29  ;;  %2010 = vmatmul.mubr.f32.gmra.mrb[28].mxu1 %v4307_v29 }
  0x9e   : > { %737 = vmatprep.mubr.f32.mxu0 %v5210_v30  ;;  %2015 = vmatprep.mubr.f32.mxu1 %v5210_v30 }
  0xa1   : > { %739 = vmatmul.mubr.f32.gmra.mrb[30].mxu0 %v4312_v62  ;;  %2017 = vmatmul.mubr.f32.gmra.mrb[30].mxu1 %v4312_v62 }
  0xa2   : > { %825 = vmatprep.mubr.f32.mxu0 %v5210_v30  ;;  %2103 = vmatprep.mubr.f32.mxu1 %v5210_v30 }
  0xa5   : > { %828 = vmatmul.mubr.f32.vlgmr.msra.gmra.mrb[0].mxu0 %v4027_v57  ;;  %2106 = vmatmul.mubr.f32.vlgmr.msra.gmra.mrb[0].mxu1 %v4027_v57  ;;  %v5224_v57 = vand.u32 4294901760, %v3987_v41  ;;  %v3356_v41 = vpack.c.bf16 %v5227_v38, %v5226_v27 }
  0xa6   : > { %3349 = vmatpush1.bf16.msra.mxu0 %v3926_v20  ;;  %833 = vmatprep.mubr.f32.mxu0 %v5210_v30 }
  0xa7   : > { %2111 = vmatprep.mubr.f32.mxu1 %v5210_v30  ;;  %3397 = vmatpush1.bf16.msra.mxu1 %v3959_v34  ;;  %v3402_v4 = vpack.c.bf16 %v5224_v57, %v5223_v44 }
  0xa8   : > { %3351 = vmatprep.subr.bf16.mxu0 %v3974_v39  ;;  %3399 = vmatprep.subr.bf16.mxu1 %v4007_v51 }
  0xa9   : > { %836 = vmatmul.mubr.f32.gmra.mrb[2].mxu0 %v4073_v5  ;;  %2114 = vmatmul.mubr.f32.gmra.mrb[2].mxu1 %v4073_v5  ;;  %v5229_v5 = vand.u32 4294901760, %v4000_v50  ;;  %v5237_v50 = vand.u32 4294901760, %v4156_v22  ;;  %v5245_v22 = vld [vmem:[#allocation9_spill] sm:$0xff] }
  0xaa   : > { %841 = vmatprep.mubr.f32.mxu0 %v5210_v30  ;;  %2119 = vmatprep.mubr.f32.mxu1 %v5210_v30 }
  0xab   : > { %3353 = vmatpush1.bf16.msra.mxu0 %v3980_v40  ;;  %3401 = vmatpush1.bf16.msra.mxu1 %v4017_v54 }
  0xac   : > { %3355 = vmatprep.subr.bf16.mxu0 %v3354_v58  ;;  %3403 = vmatprep.subr.bf16.mxu1 %v3402_v4 }
  0xad   : > { %844 = vmatmul.mubr.f32.gmra.mrb[4].mxu0 %v4081_v15  ;;  %2122 = vmatmul.mubr.f32.gmra.mrb[4].mxu1 %v4081_v15 }
  0xae   : > { %849 = vmatprep.mubr.f32.mxu0 %v5210_v30  ;;  %2127 = vmatprep.mubr.f32.mxu1 %v5210_v30 }
  0xb1   : > { %852 = vmatmul.mubr.f32.gmra.mrb[6].mxu0 %v4093_v49  ;;  %2130 = vmatmul.mubr.f32.gmra.mrb[6].mxu1 %v4093_v49  ;;  %v5230_v49 = vand.u32 4294901760, %v4011_v53  ;;  %v5238_v53 = vand.u32 4294901760, %v4161_v31  ;;  %v5246_v31 = vld [vmem:[#allocation10_spill] sm:$0xff] }
  0xb2   : > { %857 = vmatprep.mubr.f32.mxu0 %v5210_v30  ;;  %2135 = vmatprep.mubr.f32.mxu1 %v5210_v30 }
  0xb5   : > { %860 = vmatmul.mubr.f32.gmra.mrb[8].mxu0 %v4111_v3  ;;  %2138 = vmatmul.mubr.f32.gmra.mrb[8].mxu1 %v4111_v3  ;;  %v5231_v3 = vand.u32 4294901760, %v4099_v26  ;;  %v3408_v26 = vpack.c.bf16 %v5238_v53, %v5237_v50 }
  0xb6   : > { %865 = vmatprep.mubr.f32.mxu0 %v5210_v30  ;;  %2143 = vmatprep.mubr.f32.mxu1 %v5210_v30 }
  0xb9   : > { %868 = vmatmul.mubr.f32.gmra.mrb[10].mxu0 %v4117_v28  ;;  %2146 = vmatmul.mubr.f32.gmra.mrb[10].mxu1 %v4117_v28  ;;  %v3358_v28 = vpack.c.bf16 %v5231_v3, %v5230_v49 }
  0xba   : > { %873 = vmatprep.mubr.f32.mxu0 %v5210_v30  ;;  %2151 = vmatprep.mubr.f32.mxu1 %v5210_v30 }
  0xbd   : > { %876 = vmatmul.mubr.f32.gmra.mrb[12].mxu0 %v4169_v43  ;;  %2154 = vmatmul.mubr.f32.gmra.mrb[12].mxu1 %v4169_v43  ;;  %v5232_v43 = vand.u32 4294901760, %v4139_v13  ;;  %v5239_v13 = vld [vmem:[#allocation3_spill] sm:$0xff] }
  0xbe   : > { %881 = vmatprep.mubr.f32.mxu0 %v5210_v30  ;;  %2159 = vmatprep.mubr.f32.mxu1 %v5210_v30 }
  0xc1   : > { %884 = vmatmul.mubr.f32.gmra.mrb[14].mxu0 %v4172_v17  ;;  %2162 = vmatmul.mubr.f32.gmra.mrb[14].mxu1 %v4172_v17  ;;  %v5233_v17 = vand.u32 4294901760, %v4144_v18  ;;  %v5242_v18 = vld [vmem:[#allocation6_spill] sm:$0xff] }
  0xc2   : > { %889 = vmatprep.mubr.f32.mxu0 %v5210_v30  ;;  %2167 = vmatprep.mubr.f32.mxu1 %v5210_v30 }
  0xc5   : > { %892 = vmatmul.mubr.f32.gmra.mrb[16].mxu0 %v4223_v1  ;;  %2170 = vmatmul.mubr.f32.gmra.mrb[16].mxu1 %v4223_v1  ;;  %v5228_v1 = vand.u32 4294901760, %v3990_v42  ;;  %v3360_v42 = vpack.c.bf16 %v5236_v37, %v5235_v33 }
  0xc6   : > { %897 = vmatprep.mubr.f32.mxu0 %v5210_v30  ;;  %2175 = vmatprep.mubr.f32.mxu1 %v5210_v30 }
  0xc7   : > { %v3404_v15 = vpack.c.bf16 %v5229_v5, %v5228_v1 }
  0xc9   : > { %900 = vmatmul.mubr.f32.gmra.mrb[18].mxu0 %v4244_v56  ;;  %2178 = vmatmul.mubr.f32.gmra.mrb[18].mxu1 %v4244_v56  ;;  %v5234_v56 = vld [vmem:[#allocation2_spill] sm:$0xff] }
  0xca   : > { %905 = vmatprep.mubr.f32.mxu0 %v5210_v30  ;;  %2183 = vmatprep.mubr.f32.mxu1 %v5210_v30 }
  0xcd   : > { %908 = vmatmul.mubr.f32.gmra.mrb[20].mxu0 %v4264_v46  ;;  %2186 = vmatmul.mubr.f32.gmra.mrb[20].mxu1 %v4264_v46  ;;  %v5247_v46 = vld [vmem:[#allocation11_spill] sm:$0xff] }
  0xce   : > { %913 = vmatprep.mubr.f32.mxu0 %v5210_v30  ;;  %2191 = vmatprep.mubr.f32.mxu1 %v5210_v30 }
  0xd1   : > { %916 = vmatmul.mubr.f32.gmra.mrb[22].mxu0 %v5225_v23  ;;  %2194 = vmatmul.mubr.f32.gmra.mrb[22].mxu1 %v5225_v23 }
  0xd2   : > { %921 = vmatprep.mubr.f32.mxu0 %v5210_v30  ;;  %2199 = vmatprep.mubr.f32.mxu1 %v5210_v30 }
  0xd5   : > { %924 = vmatmul.mubr.f32.gmra.mrb[24].mxu0 %v4294_v35  ;;  %2202 = vmatmul.mubr.f32.gmra.mrb[24].mxu1 %v4294_v35  ;;  %v5250_v35 = vld [vmem:[#allocation15_spill] sm:$0xff] }
  0xd6   : > { %929 = vmatprep.mubr.f32.mxu0 %v5210_v30  ;;  %2207 = vmatprep.mubr.f32.mxu1 %v5210_v30 }
  0xd9   : > { %932 = vmatmul.mubr.f32.gmra.mrb[26].mxu0 %v4300_v19  ;;  %2210 = vmatmul.mubr.f32.gmra.mrb[26].mxu1 %v4300_v19  ;;  %v3406_v19 = vpack.c.bf16 %v5233_v17, %v5232_v43 }
  0xda   : > { %937 = vmatprep.mubr.f32.mxu0 %v5210_v30  ;;  %2215 = vmatprep.mubr.f32.mxu1 %v5210_v30 }
  0xdd   : > { %940 = vmatmul.mubr.f32.gmra.mrb[28].mxu0 %v4320_v14  ;;  %2218 = vmatmul.mubr.f32.gmra.mrb[28].mxu1 %v4320_v14  ;;  %v5249_v14 = vld [vmem:[#allocation14_spill] sm:$0xff] }
  0xde   : > { %945 = vmatprep.mubr.f32.mxu0 %v5210_v30  ;;  %2223 = vmatprep.mubr.f32.mxu1 %v5210_v30 }
  0xe1   : > { %948 = vmatmul.mubr.f32.gmra.mrb[30].mxu0 %v4331_v32  ;;  %2226 = vmatmul.mubr.f32.gmra.mrb[30].mxu1 %v4331_v32  ;;  %v5248_v32 = vld [vmem:[#allocation12_spill] sm:$0xff] }
  0xe2   : > { %1026 = vmatprep.mubr.f32.mxu0 %v5210_v30  ;;  %2304 = vmatprep.mubr.f32.mxu1 %v5210_v30 }
  0xe5   : > { %1030 = vmatmul.mubr.f32.vlgmr.msra.gmra.mrb[0].mxu0 %v5234_v56  ;;  %2308 = vmatmul.mubr.f32.vlgmr.msra.gmra.mrb[0].mxu1 %v5234_v56 }
  0xe6   : > { %3357 = vmatpush1.bf16.msra.mxu0 %v3356_v41  ;;  %1035 = vmatprep.mubr.f32.mxu0 %v5210_v30 }
  0xe7   : > { %2313 = vmatprep.mubr.f32.mxu1 %v5210_v30  ;;  %3405 = vmatpush1.bf16.msra.mxu1 %v3404_v15 }
  0xe8   : > { %3359 = vmatprep.subr.bf16.mxu0 %v3358_v28  ;;  %3407 = vmatprep.subr.bf16.mxu1 %v3406_v19 }
  0xe9   : > { %1039 = vmatmul.mubr.f32.gmra.mrb[2].mxu0 %v5239_v13  ;;  %2317 = vmatmul.mubr.f32.gmra.mrb[2].mxu1 %v5239_v13 }
  0xea   : > { %1044 = vmatprep.mubr.f32.mxu0 %v5210_v30  ;;  %2322 = vmatprep.mubr.f32.mxu1 %v5210_v30 }
  0xeb   : > { %3361 = vmatpush1.bf16.msra.mxu0 %v3360_v42  ;;  %3409 = vmatpush1.bf16.msra.mxu1 %v3408_v26 }
  0xec   : > { %3363 = vmatprep.subr.bf16.mxu0 %v3909_v16  ;;  %3411 = vmatprep.subr.bf16.mxu1 %v3928_v21  ;;  %v5243_v16 = vld [vmem:[#allocation7_spill] sm:$0xff]  ;;  %v5244_v21 = vld [vmem:[#allocation8_spill] sm:$0xff] }
  0xed   : > { %1048 = vmatmul.mubr.f32.gmra.mrb[4].mxu0 %v5240_v59  ;;  %2326 = vmatmul.mubr.f32.gmra.mrb[4].mxu1 %v5240_v59 }
  0xee   : > { %1053 = vmatprep.mubr.f32.mxu0 %v5210_v30  ;;  %2331 = vmatprep.mubr.f32.mxu1 %v5210_v30 }
  0xf1   : > { %1057 = vmatmul.mubr.f32.gmra.mrb[6].mxu0 %v5241_v8  ;;  %2335 = vmatmul.mubr.f32.gmra.mrb[6].mxu1 %v5241_v8 }
  0xf2   : > { %1062 = vmatprep.mubr.f32.mxu0 %v5210_v30  ;;  %2340 = vmatprep.mubr.f32.mxu1 %v5210_v30 }
  0xf5   : > { %1066 = vmatmul.mubr.f32.gmra.mrb[8].mxu0 %v5242_v18  ;;  %2344 = vmatmul.mubr.f32.gmra.mrb[8].mxu1 %v5242_v18 }
  0xf6   : > { %1071 = vmatprep.mubr.f32.mxu0 %v5210_v30  ;;  %2349 = vmatprep.mubr.f32.mxu1 %v5210_v30 }
  0xf9   : > { %1075 = vmatmul.mubr.f32.gmra.mrb[10].mxu0 %v5243_v16  ;;  %2353 = vmatmul.mubr.f32.gmra.mrb[10].mxu1 %v5243_v16 }
  0xfa   : > { %1080 = vmatprep.mubr.f32.mxu0 %v5210_v30  ;;  %2358 = vmatprep.mubr.f32.mxu1 %v5210_v30 }
  0xfd   : > { %1084 = vmatmul.mubr.f32.gmra.mrb[12].mxu0 %v5244_v21  ;;  %2362 = vmatmul.mubr.f32.gmra.mrb[12].mxu1 %v5244_v21 }
  0xfe   : > { %1089 = vmatprep.mubr.f32.mxu0 %v5210_v30  ;;  %2367 = vmatprep.mubr.f32.mxu1 %v5210_v30 }
 0x101   : > { %1093 = vmatmul.mubr.f32.gmra.mrb[14].mxu0 %v5245_v22  ;;  %2371 = vmatmul.mubr.f32.gmra.mrb[14].mxu1 %v5245_v22 }
 0x102   : > { %1098 = vmatprep.mubr.f32.mxu0 %v5210_v30  ;;  %2376 = vmatprep.mubr.f32.mxu1 %v5210_v30 }
 0x105   : > { %1102 = vmatmul.mubr.f32.gmra.mrb[16].mxu0 %v5246_v31  ;;  %2380 = vmatmul.mubr.f32.gmra.mrb[16].mxu1 %v5246_v31 }
 0x106   : > { %1107 = vmatprep.mubr.f32.mxu0 %v5210_v30  ;;  %2385 = vmatprep.mubr.f32.mxu1 %v5210_v30 }
 0x109   : > { %1111 = vmatmul.mubr.f32.gmra.mrb[18].mxu0 %v5247_v46  ;;  %2389 = vmatmul.mubr.f32.gmra.mrb[18].mxu1 %v5247_v46 }
 0x10a   : > { %1116 = vmatprep.mubr.f32.mxu0 %v5210_v30  ;;  %2394 = vmatprep.mubr.f32.mxu1 %v5210_v30 }
 0x10d   : > { %1120 = vmatmul.mubr.f32.gmra.mrb[20].mxu0 %v5248_v32  ;;  %2398 = vmatmul.mubr.f32.gmra.mrb[20].mxu1 %v5248_v32 }
 0x10e   : > { %1125 = vmatprep.mubr.f32.mxu0 %v5210_v30  ;;  %2403 = vmatprep.mubr.f32.mxu1 %v5210_v30 }
 0x111   : > { %1129 = vmatmul.mubr.f32.gmra.mrb[22].mxu0 %v5249_v14  ;;  %2407 = vmatmul.mubr.f32.gmra.mrb[22].mxu1 %v5249_v14 }
 0x112   : > { %1134 = vmatprep.mubr.f32.mxu0 %v5210_v30  ;;  %2412 = vmatprep.mubr.f32.mxu1 %v5210_v30 }
 0x115   : > { %1138 = vmatmul.mubr.f32.gmra.mrb[24].mxu0 %v5250_v35  ;;  %2416 = vmatmul.mubr.f32.gmra.mrb[24].mxu1 %v5250_v35 }
 0x116   : > { %1143 = vmatprep.mubr.f32.mxu0 %v5210_v30  ;;  %2421 = vmatprep.mubr.f32.mxu1 %v5210_v30 }
 0x119   : > { %1147 = vmatmul.mubr.f32.gmra.mrb[26].mxu0 %v5251_v63  ;;  %2425 = vmatmul.mubr.f32.gmra.mrb[26].mxu1 %v5251_v63 }
 0x11a   : > { %1152 = vmatprep.mubr.f32.mxu0 %v5210_v30  ;;  %2430 = vmatprep.mubr.f32.mxu1 %v5210_v30 }
 0x11d   : > { %1156 = vmatmul.mubr.f32.gmra.mrb[28].mxu0 %v4327_v2  ;;  %2434 = vmatmul.mubr.f32.gmra.mrb[28].mxu1 %v4327_v2 }
 0x11e   : > { %1161 = vmatprep.mubr.f32.mxu0 %v5210_v30  ;;  %2439 = vmatprep.mubr.f32.mxu1 %v5210_v30 }
 0x121   : > { %1165 = vmatmul.mubr.f32.gmra.mrb[30].mxu0 %v4338_v55  ;;  %2443 = vmatmul.mubr.f32.gmra.mrb[30].mxu1 %v4338_v55 }
 0x122   : > { %1259 = vmatprep.mubr.f32.mxu0 %v5210_v30  ;;  %2537 = vmatprep.mubr.f32.mxu1 %v5210_v30 }
 0x125   : > { %1261 = vmatmul.mubr.f32.vlgmr.msra.gmra.mrb[0].mxu0 %v4009_v52  ;;  %2539 = vmatmul.mubr.f32.vlgmr.msra.gmra.mrb[0].mxu1 %v4009_v52 }
 0x126   : > { %3365 = vmatpush1.bf16.msra.mxu0 %v3926_v20  ;;  %1266 = vmatprep.mubr.f32.mxu0 %v5210_v30  ;;  %v210_v20 = vlaneseq }
 0x127   : > { %2544 = vmatprep.mubr.f32.mxu1 %v5210_v30  ;;  %3413 = vmatpush1.bf16.msra.mxu1 %v3959_v34 }
 0x128   : > { %3367 = vmatprep.subr.bf16.mxu0 %v3974_v39  ;;  %3415 = vmatprep.subr.bf16.mxu1 %v4007_v51  ;;  %v211_v34 = vshrl.u32 %v210_v20, 7 }
 0x129   : > { %1268 = vmatmul.mubr.f32.gmra.mrb[2].mxu0 %v4065_v0  ;;  %2546 = vmatmul.mubr.f32.gmra.mrb[2].mxu1 %v4065_v0 }
 0x12a   : > { %1273 = vmatprep.mubr.f32.mxu0 %v5210_v30  ;;  %2551 = vmatprep.mubr.f32.mxu1 %v5210_v30  ;;  %v212_v39 = vsub.s32 0, %v211_v34  ;;  %v220_v51 = vsub.s32 2, %v211_v34 }
 0x12b   : > { %3369 = vmatpush1.bf16.msra.mxu0 %v3980_v40  ;;  %3417 = vmatpush1.bf16.msra.mxu1 %v4017_v54  ;;  %v208_v40 = vld [vmem:[%s5153_s2] sm:$0xf] }
 0x12d   : > { %1275 = vmatmul.mubr.f32.gmra.mrb[4].mxu0 %v4068_v6  ;;  %2553 = vmatmul.mubr.f32.gmra.mrb[4].mxu1 %v4068_v6 }
 0x12e   : > { %1280 = vmatprep.mubr.f32.mxu0 %v5210_v30  ;;  %2558 = vmatprep.mubr.f32.mxu1 %v5210_v30 }
 0x131   : > { %1282 = vmatmul.mubr.f32.gmra.mrb[6].mxu0 %v4075_v10  ;;  %2560 = vmatmul.mubr.f32.gmra.mrb[6].mxu1 %v4075_v10 }
 0x132   : > { %1287 = vmatprep.mubr.f32.mxu0 %v5210_v30  ;;  %2565 = vmatprep.mubr.f32.mxu1 %v5210_v30 }
 0x135   : > { %1289 = vmatmul.mubr.f32.gmra.mrb[8].mxu0 %v4083_v24  ;;  %2567 = vmatmul.mubr.f32.gmra.mrb[8].mxu1 %v4083_v24 }
 0x136   : > { %1294 = vmatprep.mubr.f32.mxu0 %v5210_v30  ;;  %2572 = vmatprep.mubr.f32.mxu1 %v5210_v30 }
 0x139   : > { %1296 = vmatmul.mubr.f32.gmra.mrb[10].mxu0 %v4085_v25  ;;  %2574 = vmatmul.mubr.f32.gmra.mrb[10].mxu1 %v4085_v25 }
 0x13a   : > { %1301 = vmatprep.mubr.f32.mxu0 %v5210_v30  ;;  %2579 = vmatprep.mubr.f32.mxu1 %v5210_v30 }
 0x13d   : > { %1303 = vmatmul.mubr.f32.gmra.mrb[12].mxu0 %v4119_v7  ;;  %2581 = vmatmul.mubr.f32.gmra.mrb[12].mxu1 %v4119_v7 }
 0x13e   : > { %1308 = vmatprep.mubr.f32.mxu0 %v5210_v30  ;;  %2586 = vmatprep.mubr.f32.mxu1 %v5210_v30 }
 0x141   : > { %1310 = vmatmul.mubr.f32.gmra.mrb[14].mxu0 %v4126_v11  ;;  %2588 = vmatmul.mubr.f32.gmra.mrb[14].mxu1 %v4126_v11 }
 0x142   : > { %1315 = vmatprep.mubr.f32.mxu0 %v5210_v30  ;;  %2593 = vmatprep.mubr.f32.mxu1 %v5210_v30 }
 0x145   : > { %1317 = vmatmul.mubr.f32.gmra.mrb[16].mxu0 %v4199_v36  ;;  %2595 = vmatmul.mubr.f32.gmra.mrb[16].mxu1 %v4199_v36 }
 0x146   : > { %1322 = vmatprep.mubr.f32.mxu0 %v5210_v30  ;;  %2600 = vmatprep.mubr.f32.mxu1 %v5210_v30 }
 0x149   : > { %1324 = vmatmul.mubr.f32.gmra.mrb[18].mxu0 %v4227_v60  ;;  %2602 = vmatmul.mubr.f32.gmra.mrb[18].mxu1 %v4227_v60 }
 0x14a   : > { %1329 = vmatprep.mubr.f32.mxu0 %v5210_v30  ;;  %2607 = vmatprep.mubr.f32.mxu1 %v5210_v30 }
 0x14d   : > { %1331 = vmatmul.mubr.f32.gmra.mrb[20].mxu0 %v4246_v12  ;;  %2609 = vmatmul.mubr.f32.gmra.mrb[20].mxu1 %v4246_v12 }
 0x14e   : > { %1336 = vmatprep.mubr.f32.mxu0 %v5210_v30  ;;  %2614 = vmatprep.mubr.f32.mxu1 %v5210_v30 }
 0x151   : > { %1338 = vmatmul.mubr.f32.gmra.mrb[22].mxu0 %v4266_v47  ;;  %2616 = vmatmul.mubr.f32.gmra.mrb[22].mxu1 %v4266_v47 }
 0x152   : > { %1343 = vmatprep.mubr.f32.mxu0 %v5210_v30  ;;  %2621 = vmatprep.mubr.f32.mxu1 %v5210_v30 }
 0x155   : > { %1345 = vmatmul.mubr.f32.gmra.mrb[24].mxu0 %v4281_v45  ;;  %2623 = vmatmul.mubr.f32.gmra.mrb[24].mxu1 %v4281_v45 }
 0x156   : > { %1350 = vmatprep.mubr.f32.mxu0 %v5210_v30  ;;  %2628 = vmatprep.mubr.f32.mxu1 %v5210_v30 }
 0x159   : > { %1352 = vmatmul.mubr.f32.gmra.mrb[26].mxu0 %v4286_v61  ;;  %2630 = vmatmul.mubr.f32.gmra.mrb[26].mxu1 %v4286_v61 }
 0x15a   : > { %1357 = vmatprep.mubr.f32.mxu0 %v5210_v30  ;;  %2635 = vmatprep.mubr.f32.mxu1 %v5210_v30 }
 0x15d   : > { %1359 = vmatmul.mubr.f32.gmra.mrb[28].mxu0 %v4307_v29  ;;  %2637 = vmatmul.mubr.f32.gmra.mrb[28].mxu1 %v4307_v29 }
 0x15e   : > { %1364 = vmatprep.mubr.f32.mxu0 %v5210_v30  ;;  %2642 = vmatprep.mubr.f32.mxu1 %v5210_v30 }
 0x161   : > { %1366 = vmatmul.mubr.f32.gmra.mrb[30].mxu0 %v4312_v62  ;;  %2644 = vmatmul.mubr.f32.gmra.mrb[30].mxu1 %v4312_v62 }
 0x162   : > { %1444 = vmatprep.mubr.f32.mxu0 %v5210_v30  ;;  %2722 = vmatprep.mubr.f32.mxu1 %v5210_v30 }
 0x165   : > { %1446 = vmatmul.mubr.f32.vlgmr.msra.gmra.mrb[0].mxu0 %v4009_v52  ;;  %2724 = vmatmul.mubr.f32.vlgmr.msra.gmra.mrb[0].mxu1 %v4009_v52  ;;  %v4733_v52 = vrot.slane %v208_v40, %v212_v39 }
 0x166   : > { %1451 = vmatprep.mubr.f32.mxu0 %v5210_v30  ;;  %2729 = vmatprep.mubr.f32.mxu1 %v5210_v30 }
 0x169   : > { %1453 = vmatmul.mubr.f32.gmra.mrb[2].mxu0 %v4065_v0  ;;  %2731 = vmatmul.mubr.f32.gmra.mrb[2].mxu1 %v4065_v0  ;;  %v224_v0 = vsub.s32 3, %v211_v34 }
 0x16a   : > { %1458 = vmatprep.mubr.f32.mxu0 %v5210_v30  ;;  %2736 = vmatprep.mubr.f32.mxu1 %v5210_v30 }
 0x16d   : > { %1460 = vmatmul.mubr.f32.gmra.mrb[4].mxu0 %v4068_v6  ;;  %2738 = vmatmul.mubr.f32.gmra.mrb[4].mxu1 %v4068_v6  ;;  %v4737_v6 = vrot.slane %v208_v40, %v220_v51 }
 0x16e   : > { %1465 = vmatprep.mubr.f32.mxu0 %v5210_v30  ;;  %2743 = vmatprep.mubr.f32.mxu1 %v5210_v30 }
 0x171   : > { %1467 = vmatmul.mubr.f32.gmra.mrb[6].mxu0 %v4075_v10  ;;  %2745 = vmatmul.mubr.f32.gmra.mrb[6].mxu1 %v4075_v10 }
 0x172   : > { %1472 = vmatprep.mubr.f32.mxu0 %v5210_v30  ;;  %2750 = vmatprep.mubr.f32.mxu1 %v5210_v30 }
 0x175   : > { %1474 = vmatmul.mubr.f32.gmra.mrb[8].mxu0 %v4083_v24  ;;  %2752 = vmatmul.mubr.f32.gmra.mrb[8].mxu1 %v4083_v24 }
 0x176   : > { %1479 = vmatprep.mubr.f32.mxu0 %v5210_v30  ;;  %2757 = vmatprep.mubr.f32.mxu1 %v5210_v30 }
 0x179   : > { %1481 = vmatmul.mubr.f32.gmra.mrb[10].mxu0 %v4085_v25  ;;  %2759 = vmatmul.mubr.f32.gmra.mrb[10].mxu1 %v4085_v25 }
 0x17a   : > { %1486 = vmatprep.mubr.f32.mxu0 %v5210_v30  ;;  %2764 = vmatprep.mubr.f32.mxu1 %v5210_v30 }
 0x17d   : > { %1488 = vmatmul.mubr.f32.gmra.mrb[12].mxu0 %v4119_v7  ;;  %2766 = vmatmul.mubr.f32.gmra.mrb[12].mxu1 %v4119_v7 }
 0x17e   : > { %1493 = vmatprep.mubr.f32.mxu0 %v5210_v30  ;;  %2771 = vmatprep.mubr.f32.mxu1 %v5210_v30 }
 0x181   : > { %1495 = vmatmul.mubr.f32.gmra.mrb[14].mxu0 %v4126_v11  ;;  %2773 = vmatmul.mubr.f32.gmra.mrb[14].mxu1 %v4126_v11 }
 0x182   : > { %1500 = vmatprep.mubr.f32.mxu0 %v5210_v30  ;;  %2778 = vmatprep.mubr.f32.mxu1 %v5210_v30 }
 0x185   : > { %1502 = vmatmul.mubr.f32.gmra.mrb[16].mxu0 %v4199_v36  ;;  %2780 = vmatmul.mubr.f32.gmra.mrb[16].mxu1 %v4199_v36  ;;  %v4741_v36 = vrot.slane %v208_v40, %v224_v0 }
 0x186   : > { %1507 = vmatprep.mubr.f32.mxu0 %v5210_v30  ;;  %2785 = vmatprep.mubr.f32.mxu1 %v5210_v30 }
 0x189   : > { %1509 = vmatmul.mubr.f32.gmra.mrb[18].mxu0 %v4227_v60  ;;  %2787 = vmatmul.mubr.f32.gmra.mrb[18].mxu1 %v4227_v60 }
 0x18a   : > { %1514 = vmatprep.mubr.f32.mxu0 %v5210_v30  ;;  %2792 = vmatprep.mubr.f32.mxu1 %v5210_v30 }
 0x18d   : > { %1516 = vmatmul.mubr.f32.gmra.mrb[20].mxu0 %v4246_v12  ;;  %2794 = vmatmul.mubr.f32.gmra.mrb[20].mxu1 %v4246_v12 }
 0x18e   : > { %1521 = vmatprep.mubr.f32.mxu0 %v5210_v30  ;;  %2799 = vmatprep.mubr.f32.mxu1 %v5210_v30 }
 0x191   : > { %1523 = vmatmul.mubr.f32.gmra.mrb[22].mxu0 %v4266_v47  ;;  %2801 = vmatmul.mubr.f32.gmra.mrb[22].mxu1 %v4266_v47  ;;  %v216_v47 = vsub.s32 1, %v211_v34 }
 0x192   : > { %1528 = vmatprep.mubr.f32.mxu0 %v5210_v30  ;;  %2806 = vmatprep.mubr.f32.mxu1 %v5210_v30 }
 0x193   : > { %v4735_v54 = vrot.slane %v208_v40, %v216_v47 }
 0x195   : > { %1530 = vmatmul.mubr.f32.gmra.mrb[24].mxu0 %v4281_v45  ;;  %2808 = vmatmul.mubr.f32.gmra.mrb[24].mxu1 %v4281_v45 }
 0x196   : > { %1535 = vmatprep.mubr.f32.mxu0 %v5210_v30  ;;  %2813 = vmatprep.mubr.f32.mxu1 %v5210_v30 }
 0x199   : > { %1537 = vmatmul.mubr.f32.gmra.mrb[26].mxu0 %v4286_v61  ;;  %2815 = vmatmul.mubr.f32.gmra.mrb[26].mxu1 %v4286_v61 }
 0x19a   : > { %1542 = vmatprep.mubr.f32.mxu0 %v5210_v30  ;;  %2820 = vmatprep.mubr.f32.mxu1 %v5210_v30 }
 0x19d   : > { %1544 = vmatmul.mubr.f32.gmra.mrb[28].mxu0 %v4307_v29  ;;  %2822 = vmatmul.mubr.f32.gmra.mrb[28].mxu1 %v4307_v29 }
 0x19e   : > { %1549 = vmatprep.mubr.f32.mxu0 %v5210_v30  ;;  %2827 = vmatprep.mubr.f32.mxu1 %v5210_v30 }
 0x1a1   : > { %1551 = vmatmul.mubr.f32.gmra.mrb[30].mxu0 %v4312_v62  ;;  %2829 = vmatmul.mubr.f32.gmra.mrb[30].mxu1 %v4312_v62 }
 0x238   : > { %v1447_v10 = vpop.f32.mrb[0].mxu0  ;;  %v2725_v24 = vpop.f32.mrb[0].mxu1 }
 0x239   : > { %v3418_v25 = vadd.f32 %v1447_v10, %v4733_v52  ;;  %v1449_v45 = vpop.f32.mrb[1].mxu0  ;;  %v2727_v7 = vpop.f32.mrb[1].mxu1  ;;  %v3450_v30 = vadd.f32 %v2725_v24, %v4737_v6 }
 0x23a   : > { %v3419_v11 = vadd.f32 %v1449_v45, %v4735_v54  ;;  %v3451_v55 = vadd.f32 %v2727_v7, %v4741_v36 }
 0x23c   : > { %v2835_v60 = vadd.f32 %v3419_v11, %v3418_v25  ;;  %v1454_v12 = vpop.f32.mrb[2].mxu0  ;;  %v2732_v61 = vpop.f32.mrb[2].mxu1 }
 0x23d   : > { %v3420_v29 = vadd.f32 %v1454_v12, %v4733_v52  ;;  %v1456_v62 = vpop.f32.mrb[3].mxu0  ;;  %v2734_v2 = vpop.f32.mrb[3].mxu1  ;;  %v3452_v44 = vadd.f32 %v2732_v61, %v4737_v6 }
 0x23e   : > { %v2851_v48 = vadd.f32 %v3450_v30, %v2835_v60  ;;  %v3421_v9 = vadd.f32 %v1456_v62, %v4735_v54  ;;  %v3453_v49 = vadd.f32 %v2734_v2, %v4741_v36 }
 0x240   : > { %v2867_v58 = vadd.f32 %v3451_v55, %v2851_v48  ;;  %v2836_v57 = vadd.f32 %v3421_v9, %v3420_v29  ;;  %v1461_v4 = vpop.f32.mrb[4].mxu0  ;;  %v2739_v23 = vpop.f32.mrb[4].mxu1 }
 0x241   : > { %v3422_v27 = vadd.f32 %v1461_v4, %v4733_v52  ;;  %v1463_v38 = vpop.f32.mrb[5].mxu0  ;;  %v2741_v41 = vpop.f32.mrb[5].mxu1  ;;  %v3454_v37 = vadd.f32 %v2739_v23, %v4737_v6 }
 0x242   : > { %v2883_v1 = vmul.f32 0.25, %v2867_v58  ;;  %v2852_v5 = vadd.f32 %v3452_v44, %v2836_v57  ;;  %v3423_v15 = vadd.f32 %v1463_v38, %v4735_v54  ;;  %v3455_v31 = vadd.f32 %v2741_v41, %v4741_v36 }
 0x244   : > { %v2899_v3 = vsub.f32 %v3418_v25, %v2883_v1  ;;  %v2947_v28 = vsub.f32 %v3419_v11, %v2883_v1  ;;  %v2995_v43 = vsub.f32 %v3450_v30, %v2883_v1  ;;  %v3043_v17 = vsub.f32 %v3451_v55, %v2883_v1  ;;  %3219 = vst [vmem:[%s4752_s4] sm:$0xff] %v2883_v1  ;;  %v1468_v19 = vpop.f32.mrb[6].mxu0  ;;  %v2746_v56 = vpop.f32.mrb[6].mxu1 }
 0x245   : > { %v2868_v33 = vadd.f32 %v3453_v49, %v2852_v5  ;;  %v2837_v42 = vadd.f32 %v3423_v15, %v3422_v27  ;;  %v1470_v50 = vpop.f32.mrb[7].mxu0  ;;  %v2748_v53 = vpop.f32.mrb[7].mxu1  ;;  %v3424_v59 = vadd.f32 %v1468_v19, %v4733_v52  ;;  %v3456_v46 = vadd.f32 %v2746_v56, %v4737_v6 }
 0x246   : > { %v2915_v26 = vmul.f32 %v2899_v3, %v2899_v3  ;;  %v2963_v13 = vmul.f32 %v2947_v28, %v2947_v28  ;;  %v3425_v16 = vadd.f32 %v1470_v50, %v4735_v54  ;;  %v3011_v22 = vmul.f32 %v2995_v43, %v2995_v43 }
 0x247   : > { %v2884_v8 = vmul.f32 0.25, %v2868_v33  ;;  %v2853_v18 = vadd.f32 %v3454_v37, %v2837_v42  ;;  %v3059_v51 = vmul.f32 %v3043_v17, %v3043_v17  ;;  %v3457_v30 = vadd.f32 %v2748_v53, %v4741_v36 }
 0x248   : > { %v2979_v21 = vadd.f32 %v2963_v13, %v2915_v26  ;;  %v1475_v32 = vpop.f32.mrb[8].mxu0  ;;  %v2753_v14 = vpop.f32.mrb[8].mxu1  ;;  %v2838_v10 = vadd.f32 %v3425_v16, %v3424_v59 }
 0x249   : > { %v2900_v35 = vsub.f32 %v3420_v29, %v2884_v8  ;;  %v2948_v63 = vsub.f32 %v3421_v9, %v2884_v8  ;;  %v2996_v20 = vsub.f32 %v3452_v44, %v2884_v8  ;;  %v3044_v34 = vsub.f32 %v3453_v49, %v2884_v8  ;;  %3221 = vst [vmem:[%s4752_s4 + $0x10] sm:$0xff] %v2884_v8  ;;  %v1477_v39 = vpop.f32.mrb[9].mxu0  ;;  %v2755_v40 = vpop.f32.mrb[9].mxu1 }
 0x24a   : > { %v3027_v47 = vadd.f32 %v3011_v22, %v2979_v21  ;;  %v2869_v0 = vadd.f32 %v3455_v31, %v2853_v18  ;;  %v4765_v45 = vadd.f32 %v1475_v32, %v4733_v52  ;;  %v2854_v60 = vadd.f32 %v3456_v46, %v2838_v10 }
 0x24b   : > { %v2916_v24 = vmul.f32 %v2900_v35, %v2900_v35  ;;  %v2964_v25 = vmul.f32 %v2948_v63, %v2948_v63  ;;  %v3012_v62 = vmul.f32 %v2996_v20, %v2996_v20  ;;  %v3060_v2 = vmul.f32 %v3044_v34, %v3044_v34 }
 0x24c   : > { %v3075_v7 = vadd.f32 %v3059_v51, %v3027_v47  ;;  %v2885_v11 = vmul.f32 0.25, %v2869_v0  ;;  %v1482_v12 = vpop.f32.mrb[10].mxu0  ;;  %v2760_v61 = vpop.f32.mrb[10].mxu1  ;;  %v4769_v55 = vadd.f32 %v1477_v39, %v4735_v54  ;;  %v2870_v41 = vadd.f32 %v3457_v30, %v2854_v60 }
 0x24d   : > { %v2980_v29 = vadd.f32 %v2964_v25, %v2916_v24  ;;  %v1484_v48 = vpop.f32.mrb[11].mxu0  ;;  %v2762_v9 = vpop.f32.mrb[11].mxu1  ;;  %v3458_v5 = vadd.f32 %v2753_v14, %v4737_v6  ;;  %v4781_v56 = vadd.f32 %v2755_v40, %v4741_v36  ;;  %v4802_v34 = vadd.f32 %v2760_v61, %v4737_v6 }
 0x24e   : > { %v4771_v58 = vmul.f32 0.33333334, %v3075_v7  ;;  %v2901_v44 = vsub.f32 %v3422_v27, %v2885_v11  ;;  %v2949_v57 = vsub.f32 %v3423_v15, %v2885_v11  ;;  %v2997_v4 = vsub.f32 %v3454_v37, %v2885_v11  ;;  %3223 = vst [vmem:[%s4752_s4 + $0x20] sm:$0xff] %v2885_v11 }
 0x24f   : > { %v3028_v23 = vadd.f32 %v3012_v62, %v2980_v29  ;;  %v3045_v38 = vsub.f32 %v3455_v31, %v2885_v11  ;;  %v2839_v1 = vadd.f32 %v4769_v55, %v4765_v45  ;;  %v2886_v19 = vmul.f32 0.25, %v2870_v41 }
 0x250   : > { %3811 = vrsqrt.f32 %v4771_v58  ;;  %v1489_v49 = vpop.f32.mrb[12].mxu0  ;;  %v2767_v3 = vpop.f32.mrb[12].mxu1  ;;  %v2917_v43 = vmul.f32 %v2901_v44, %v2901_v44  ;;  %v2965_v17 = vmul.f32 %v2949_v57, %v2949_v57  ;;  %v4784_v37 = vadd.f32 %v1482_v12, %v4733_v52 }
 0x251   : > { %v3076_v28 = vadd.f32 %v3060_v2, %v3028_v23  ;;  %v1491_v27 = vpop.f32.mrb[13].mxu0  ;;  %v4778_v15 = vpop.f32.mrb[13].mxu1  ;;  %v2855_v33 = vadd.f32 %v3458_v5, %v2839_v1  ;;  %v3013_v53 = vmul.f32 %v2997_v4, %v2997_v4  ;;  %v4789_v26 = vadd.f32 %v1484_v48, %v4735_v54  ;;  %3225 = vst [vmem:[%s4752_s4 + $0x30] sm:$0xff] %v2886_v19 }
 0x252   : > { %v2981_v50 = vadd.f32 %v2965_v17, %v2917_v43  ;;  %v2902_v13 = vsub.f32 %v3424_v59, %v2886_v19  ;;  %v2950_v8 = vsub.f32 %v3425_v16, %v2886_v19  ;;  %v2998_v18 = vsub.f32 %v3456_v46, %v2886_v19 }
 0x253   : > { %v4786_v42 = vmul.f32 0.33333334, %v3076_v28  ;;  %v3046_v21 = vsub.f32 %v3457_v30, %v2886_v19  ;;  %vm3109_vm1 = vcmp.eq.f32.partialorder %v4771_v58, inf  ;;  %vm3111_vm2 = vcmp.eq.f32.partialorder %v4771_v58, 0.0 }
 0x254   : > { %v1496_v22 = vpop.f32.mrb[14].mxu0  ;;  %v4792_v31 = vpop.f32.mrb[14].mxu1  ;;  %v3112_v32 = vand.u32 2147483648, %v4771_v58  ;;  %v3029_v63 = vadd.f32 %v3013_v53, %v2981_v50  ;;  %v3061_v59 = vmul.f32 %v3045_v38, %v3045_v38  ;;  %v2918_v16 = vmul.f32 %v2902_v13, %v2902_v13 }
 0x255   : > { %3813 = vrsqrt.f32 %v4786_v42  ;;  %v1498_v14 = vpop.f32.mrb[15].mxu0  ;;  %v4798_v35 = vpop.f32.mrb[15].mxu1  ;;  %v2966_v46 = vmul.f32 %v2950_v8, %v2950_v8  ;;  %v2871_v20 = vadd.f32 %v4781_v56, %v2855_v33  ;;  %v2840_v39 = vadd.f32 %v4789_v26, %v4784_v37 }
 0x256   : > { %v4807_v40 = vadd.f32 %v1489_v49, %v4733_v52  ;;  %v3077_v47 = vadd.f32 %v3061_v59, %v3029_v63  ;;  %v3014_v0 = vmul.f32 %v2998_v18, %v2998_v18  ;;  %v4810_v10 = vadd.f32 %v1491_v27, %v4735_v54 }
 0x257   : > { %v2982_v51 = vadd.f32 %v2966_v46, %v2918_v16  ;;  %vm3116_vm3 = vcmp.eq.f32.partialorder %v4786_v42, inf  ;;  %v2887_v7 = vmul.f32 0.25, %v2871_v20  ;;  %v3461_v11 = vadd.f32 %v2762_v9, %v4741_v36 }
 0x258   : > { %v4812_v24 = vpop.f32.mrb[16].mxu0  ;;  %v4814_v25 = vpop.f32.mrb[16].mxu1  ;;  %v2856_v30 = vadd.f32 %v4802_v34, %v2840_v39  ;;  %v4823_v29 = vmul.f32 0.33333334, %v3077_v47  ;;  %v3062_v2 = vmul.f32 %v3046_v21, %v3046_v21  ;;  %v2841_v48 = vadd.f32 %v4810_v10, %v4807_v40 }
 0x259   : > { %v4819_v60 = vpop.f32.mrb[17].mxu0  ;;  %v4821_v12 = vpop.f32.mrb[17].mxu1  ;;  %v3030_v62 = vadd.f32 %v3014_v0, %v2982_v51  ;;  %v2903_v57 = vsub.f32 %v4765_v45, %v2887_v7  ;;  %v2951_v9 = vsub.f32 %v4769_v55, %v2887_v7  ;;  %v2999_v4 = vsub.f32 %v3458_v5, %v2887_v7  ;;  %3227 = vst [vmem:[%s4752_s4 + $0x40] sm:$0xff] %v2887_v7 }
 0x25a   : > { %v3812_v61 = vpop.eup %3811  ;;  %vm3118_vm4 = vcmp.eq.f32.partialorder %v4786_v42, 0.0  ;;  %v3119_v23 = vand.u32 2147483648, %v4786_v42  ;;  %3815 = vrsqrt.f32 %v4823_v29  ;;  %v3462_v38 = vadd.f32 %v2767_v3, %v4737_v6 }
 0x25b   : > { %v3108_v44 = vmul.f32 %v3812_v61, %v4771_v58  ;;  %v3078_v55 = vadd.f32 %v3062_v2, %v3030_v62  ;;  %v2919_v5 = vmul.f32 %v2903_v57, %v2903_v57  ;;  %v2967_v49 = vmul.f32 %v2951_v9, %v2951_v9 }
 0x25c   : > { %v4835_v41 = vpop.f32.mrb[18].mxu0  ;;  %v4837_v1 = vpop.f32.mrb[18].mxu1  ;;  %v3047_v3 = vsub.f32 %v4781_v56, %v2887_v7  ;;  %v2872_v27 = vadd.f32 %v3461_v11, %v2856_v30  ;;  %v4851_v19 = vadd.f32 %v4778_v15, %v4741_v36  ;;  %v2857_v13 = vadd.f32 %v3462_v38, %v2841_v48 }
 0x25d   : > { %v3110_v45 = vsel %vm3109_vm1, %v4771_v58, %v3108_v44  ;;  %v4842_v28 = vpop.f32.mrb[19].mxu0  ;;  %v4844_v43 = vpop.f32.mrb[19].mxu1  ;;  %v4854_v50 = vmul.f32 0.33333334, %v3078_v55  ;;  %v2983_v53 = vadd.f32 %v2967_v49, %v2919_v5  ;;  %v4857_v8 = vadd.f32 %v1496_v22, %v4733_v52 }
 0x25e   : > { %v3113_v17 = vsel %vm3111_vm2, %v3112_v32, %v3110_v45  ;;  %v3015_v58 = vmul.f32 %v2999_v4, %v2999_v4  ;;  %v2888_v21 = vmul.f32 0.25, %v2872_v27  ;;  %v4861_v56 = vadd.f32 %v1498_v14, %v4735_v54 }
 0x25f   : > { %v3814_v33 = vpop.eup %3813  ;;  %3220 = vst [vmem:[%s4752_s4 + $0x8] sm:$0xff] %v3113_v17  ;;  %vm3123_vm5 = vcmp.eq.f32.partialorder %v4823_v29, inf  ;;  %3817 = vrsqrt.f32 %v4854_v50  ;;  %v3063_v63 = vmul.f32 %v3047_v3, %v3047_v3  ;;  %v4871_v22 = vadd.f32 %v4792_v31, %v4737_v6 }
 0x260   : > { %v3115_v18 = vmul.f32 %v3814_v33, %v4786_v42  ;;  %v4863_v32 = vpop.f32.mrb[20].mxu0  ;;  %v4865_v15 = vpop.f32.mrb[20].mxu1  ;;  %v3031_v46 = vadd.f32 %v3015_v58, %v2983_v53  ;;  %v2904_v20 = vsub.f32 %v4784_v37, %v2888_v21  ;;  %v2952_v39 = vsub.f32 %v4789_v26, %v2888_v21  ;;  %3229 = vst [vmem:[%s4752_s4 + $0x50] sm:$0xff] %v2888_v21 }
 0x261   : > { %v4873_v59 = vpop.f32.mrb[21].mxu0  ;;  %v4875_v16 = vpop.f32.mrb[21].mxu1  ;;  %v3000_v31 = vsub.f32 %v4802_v34, %v2888_v21  ;;  %v3048_v51 = vsub.f32 %v3461_v11, %v2888_v21  ;;  %v2873_v0 = vadd.f32 %v4851_v19, %v2857_v13  ;;  %v2842_v62 = vadd.f32 %v4861_v56, %v4857_v8 }
 0x262   : > { %v3117_v14 = vsel %vm3116_vm3, %v4786_v42, %v3115_v18  ;;  %v3079_v7 = vadd.f32 %v3063_v63, %v3031_v46  ;;  %v2920_v30 = vmul.f32 %v2904_v20, %v2904_v20  ;;  %v2968_v61 = vmul.f32 %v2952_v39, %v2952_v39 }
 0x263   : > { %v3120_v47 = vsel %vm3118_vm4, %v3119_v23, %v3117_v14  ;;  %vm3125_vm6 = vcmp.eq.f32.partialorder %v4823_v29, 0.0  ;;  %v3126_v42 = vand.u32 2147483648, %v4823_v29  ;;  %v2889_v26 = vmul.f32 0.25, %v2873_v0 }
 0x264   : > { %3222 = vst [vmem:[%s4752_s4 + $0x18] sm:$0xff] %v3120_v47  ;;  %v4890_v2 = vpop.f32.mrb[22].mxu0  ;;  %v4892_v37 = vpop.f32.mrb[22].mxu1  ;;  %v4898_v34 = vadd.f32 %v4798_v35, %v4741_v36  ;;  %v4904_v57 = vmul.f32 0.33333334, %v3079_v7  ;;  %v2984_v9 = vadd.f32 %v2968_v61, %v2920_v30  ;;  %v3016_v4 = vmul.f32 %v3000_v31, %v3000_v31 }
 0x265   : > { %v4900_v11 = vpop.f32.mrb[23].mxu0  ;;  %v4902_v48 = vpop.f32.mrb[23].mxu1  ;;  %v2858_v23 = vadd.f32 %v4871_v22, %v2842_v62  ;;  %v2905_v55 = vsub.f32 %v4807_v40, %v2889_v26  ;;  %v2953_v5 = vsub.f32 %v4810_v10, %v2889_v26  ;;  %v3001_v49 = vsub.f32 %v3462_v38, %v2889_v26  ;;  %3231 = vst [vmem:[%s4752_s4 + $0x60] sm:$0xff] %v2889_v26 }
 0x266   : > { %v3816_v44 = vpop.eup %3815  ;;  %vm3130_vm7 = vcmp.eq.f32.partialorder %v4854_v50, inf  ;;  %3819 = vrsqrt.f32 %v4904_v57  ;;  %v3064_v35 = vmul.f32 %v3048_v51, %v3048_v51  ;;  %v4915_v17 = vadd.f32 %v4812_v24, %v4733_v52 }
 0x267   : > { %v3122_v45 = vmul.f32 %v3816_v44, %v4823_v29  ;;  %v3032_v10 = vadd.f32 %v3016_v4, %v2984_v9  ;;  %v2921_v38 = vmul.f32 %v2905_v55, %v2905_v55  ;;  %v2969_v33 = vmul.f32 %v2953_v5, %v2953_v5 }
 0x268   : > { %v4917_v3 = vpop.f32.mrb[24].mxu0  ;;  %v4919_v27 = vpop.f32.mrb[24].mxu1  ;;  %vm3132_vm8 = vcmp.eq.f32.partialorder %v4854_v50, 0.0  ;;  %v3049_v24 = vsub.f32 %v4851_v19, %v2889_v26  ;;  %v2874_v58 = vadd.f32 %v4898_v34, %v2858_v23  ;;  %v3017_v46 = vmul.f32 %v3001_v49, %v3001_v49 }
 0x269   : > { %v3124_v40 = vsel %vm3123_vm5, %v4823_v29, %v3122_v45  ;;  %v4924_v53 = vpop.f32.mrb[25].mxu0  ;;  %v4926_v13 = vpop.f32.mrb[25].mxu1  ;;  %v3080_v63 = vadd.f32 %v3064_v35, %v3032_v10  ;;  %v2985_v14 = vadd.f32 %v2969_v33, %v2921_v38  ;;  %v4936_v20 = vadd.f32 %v4819_v60, %v4735_v54 }
 0x26a   : > { %v3127_v18 = vsel %vm3125_vm6, %v3126_v42, %v3124_v40  ;;  %v3818_v21 = vpop.eup %3817  ;;  %v3133_v29 = vand.u32 2147483648, %v4854_v50  ;;  %v2890_v47 = vmul.f32 0.25, %v2874_v58  ;;  %v3466_v19 = vadd.f32 %v4814_v25, %v4737_v6 }
 0x26b   : > { %3224 = vst [vmem:[%s4752_s4 + $0x28] sm:$0xff] %v3127_v18  ;;  %v3129_v39 = vmul.f32 %v3818_v21, %v4854_v50  ;;  %v4946_v0 = vmul.f32 0.33333334, %v3080_v63  ;;  %v3033_v7 = vadd.f32 %v3017_v46, %v2985_v14  ;;  %v3065_v30 = vmul.f32 %v3049_v24, %v3049_v24 }
 0x26c   : > { %v4942_v31 = vpop.f32.mrb[26].mxu0  ;;  %v4944_v51 = vpop.f32.mrb[26].mxu1  ;;  %v2843_v60 = vadd.f32 %v4936_v20, %v4915_v17  ;;  %v2906_v42 = vsub.f32 %v4857_v8, %v2890_v47  ;;  %v2954_v26 = vsub.f32 %v4861_v56, %v2890_v47  ;;  %v3002_v44 = vsub.f32 %v4871_v22, %v2890_v47  ;;  %3233 = vst [vmem:[%s4752_s4 + $0x70] sm:$0xff] %v2890_v47 }
 0x26d   : > { %v4950_v61 = vpop.f32.mrb[27].mxu0  ;;  %v4952_v62 = vpop.f32.mrb[27].mxu1  ;;  %v3131_v25 = vsel %vm3130_vm7, %v4854_v50, %v3129_v39  ;;  %vm3137_vm9 = vcmp.eq.f32.partialorder %v4904_v57, inf  ;;  %3821 = vrsqrt.f32 %v4946_v0  ;;  %v4967_v4 = vadd.f32 %v4835_v41, %v4733_v52 }
 0x26e   : > { %v3134_v9 = vsel %vm3132_vm8, %v3133_v29, %v3131_v25  ;;  %vm3139_vm10 = vcmp.eq.f32.partialorder %v4904_v57, 0.0  ;;  %v3081_v8 = vadd.f32 %v3065_v30, %v3033_v7  ;;  %v2922_v23 = vmul.f32 %v2906_v42, %v2906_v42 }
 0x26f   : > { %3226 = vst [vmem:[%s4752_s4 + $0x38] sm:$0xff] %v3134_v9  ;;  %v2970_v56 = vmul.f32 %v2954_v26, %v2954_v26  ;;  %v3050_v50 = vsub.f32 %v4898_v34, %v2890_v47  ;;  %v3467_v55 = vadd.f32 %v4821_v12, %v4741_v36  ;;  %v2859_v5 = vadd.f32 %v3466_v19, %v2843_v60 }
 0x270   : > { %v4971_v45 = vpop.f32.mrb[28].mxu0  ;;  %v4973_v22 = vpop.f32.mrb[28].mxu1  ;;  %v3437_v41 = vadd.f32 %v4842_v28, %v4735_v54  ;;  %v3140_v10 = vand.u32 2147483648, %v4904_v57  ;;  %v4985_v38 = vmul.f32 0.33333334, %v3081_v8  ;;  %v3468_v34 = vadd.f32 %v4837_v1, %v4737_v6 }
 0x271   : > { %v4980_v49 = vpop.f32.mrb[29].mxu0  ;;  %v4982_v35 = vpop.f32.mrb[29].mxu1  ;;  %v2986_v33 = vadd.f32 %v2970_v56, %v2922_v23  ;;  %vm3144_vm11 = vcmp.eq.f32.partialorder %v4946_v0, inf  ;;  %v3018_v12 = vmul.f32 %v3002_v44, %v3002_v44  ;;  %v2875_v24 = vadd.f32 %v3467_v55, %v2859_v5 }
 0x272   : > { %v3820_v40 = vpop.eup %3819  ;;  %v2844_v28 = vadd.f32 %v3437_v41, %v4967_v4  ;;  %vm3146_vm12 = vcmp.eq.f32.partialorder %v4946_v0, 0.0  ;;  %3823 = vrsqrt.f32 %v4985_v38  ;;  %v3066_v58 = vmul.f32 %v3050_v50, %v3050_v50 }
 0x273   : > { %v3136_v18 = vmul.f32 %v3820_v40, %v4904_v57  ;;  %v3438_v21 = vadd.f32 %v4863_v32, %v4733_v52  ;;  %v3034_v46 = vadd.f32 %v3018_v12, %v2986_v33  ;;  %v2891_v39 = vmul.f32 0.25, %v2875_v24 }
 0x274   : > { %v4996_v63 = vpop.f32.mrb[30].mxu0  ;;  %v4998_v1 = vpop.f32.mrb[30].mxu1  ;;  %v2860_v29 = vadd.f32 %v3468_v34, %v2844_v28  ;;  %v3147_v32 = vand.u32 2147483648, %v4946_v0  ;;  %v3469_v60 = vadd.f32 %v4844_v43, %v4741_v36  ;;  %v3439_v25 = vadd.f32 %v4873_v59, %v4735_v54 }
 0x275   : > { %v3138_v14 = vsel %vm3137_vm9, %v4904_v57, %v3136_v18  ;;  %v5003_v47 = vpop.f32.mrb[31].mxu0  ;;  %v5005_v7 = vpop.f32.mrb[31].mxu1  ;;  %v3082_v42 = vadd.f32 %v3066_v58, %v3034_v46  ;;  %v2907_v26 = vsub.f32 %v4915_v17, %v2891_v39  ;;  %v2955_v44 = vsub.f32 %v4936_v20, %v2891_v39  ;;  %3235 = vst [vmem:[%s4752_s4 + $0x80] sm:$0xff] %v2891_v39 }
 0x276   : > { %v3141_v30 = vsel %vm3139_vm10, %v3140_v10, %v3138_v14  ;;  %v3003_v9 = vsub.f32 %v3466_v19, %v2891_v39  ;;  %v3051_v8 = vsub.f32 %v3467_v55, %v2891_v39  ;;  %v2876_v23 = vadd.f32 %v3469_v60, %v2860_v29 }
 0x277   : > { %3228 = vst [vmem:[%s4752_s4 + $0x48] sm:$0xff] %v3141_v30  ;;  %v3470_v57 = vadd.f32 %v4865_v15, %v4737_v6  ;;  %v2845_v56 = vadd.f32 %v3439_v25, %v3438_v21  ;;  %v3822_v50 = vpop.eup %3821  ;;  %vm3151_vm13 = vcmp.eq.f32.partialorder %v4985_v38, inf  ;;  %v5021_v43 = vmul.f32 0.33333334, %v3082_v42 }
 0x278   : > { %v2923_v59 = vmul.f32 %v2907_v26, %v2907_v26  ;;  %v2971_v5 = vmul.f32 %v2955_v44, %v2955_v44  ;;  %v3143_v17 = vmul.f32 %v3822_v50, %v4946_v0  ;;  %vm3153_vm14 = vcmp.eq.f32.partialorder %v4985_v38, 0.0 }
 0x279   : > { %v2892_v20 = vmul.f32 0.25, %v2876_v23  ;;  %v2861_v19 = vadd.f32 %v3470_v57, %v2845_v56  ;;  %v3154_v55 = vand.u32 2147483648, %v4985_v38  ;;  %3825 = vrsqrt.f32 %v5021_v43 }
 0x27a   : > { %v3019_v15 = vmul.f32 %v3003_v9, %v3003_v9  ;;  %v3471_v40 = vadd.f32 %v4875_v16, %v4741_v36  ;;  %v3145_v10 = vsel %vm3144_vm11, %v4946_v0, %v3143_v17  ;;  %v2987_v33 = vadd.f32 %v2971_v5, %v2923_v59 }
 0x27b   : > { %v2908_v18 = vsub.f32 %v4967_v4, %v2892_v20  ;;  %v2956_v12 = vsub.f32 %v3437_v41, %v2892_v20  ;;  %3237 = vst [vmem:[%s4752_s4 + $0x90] sm:$0xff] %v2892_v20  ;;  %v3148_v24 = vsel %vm3146_vm12, %v3147_v32, %v3145_v10  ;;  %v3004_v28 = vsub.f32 %v3468_v34, %v2892_v20 }
 0x27c   : > { %v3052_v58 = vsub.f32 %v3469_v60, %v2892_v20  ;;  %v2877_v14 = vadd.f32 %v3471_v40, %v2861_v19  ;;  %v3824_v46 = vpop.eup %3823  ;;  %3230 = vst [vmem:[%s4752_s4 + $0x58] sm:$0xff] %v3148_v24  ;;  %v3035_v39 = vadd.f32 %v3019_v15, %v2987_v33  ;;  %v3067_v16 = vmul.f32 %v3051_v8, %v3051_v8 }
 0x27d   : > { %v2924_v29 = vmul.f32 %v2908_v18, %v2908_v18  ;;  %v2972_v30 = vmul.f32 %v2956_v12, %v2956_v12  ;;  %v3150_v42 = vmul.f32 %v3824_v46, %v4985_v38  ;;  %v3440_v4 = vadd.f32 %v4890_v2, %v4733_v52 }
 0x27e   : > { %v2893_v26 = vmul.f32 0.25, %v2877_v14  ;;  %v3472_v0 = vadd.f32 %v4892_v37, %v4737_v6  ;;  %v3083_v41 = vadd.f32 %v3067_v16, %v3035_v39  ;;  %v3020_v32 = vmul.f32 %v3004_v28, %v3004_v28 }
 0x27f   : > { %v2988_v34 = vadd.f32 %v2972_v30, %v2924_v29  ;;  %v3441_v60 = vadd.f32 %v4900_v11, %v4735_v54  ;;  %v3152_v44 = vsel %vm3151_vm13, %v4985_v38, %v3150_v42  ;;  %v3068_v59 = vmul.f32 %v3052_v58, %v3052_v58 }
 0x280   : > { %v2909_v9 = vsub.f32 %v3438_v21, %v2893_v26  ;;  %v2957_v8 = vsub.f32 %v3439_v25, %v2893_v26  ;;  %v3005_v23 = vsub.f32 %v3470_v57, %v2893_v26  ;;  %3239 = vst [vmem:[%s4752_s4 + $0xa0] sm:$0xff] %v2893_v26  ;;  %v3155_v2 = vsel %vm3153_vm14, %v3154_v55, %v3152_v44 }
 0x281   : > { %v5050_v56 = vmul.f32 0.33333334, %v3083_v41  ;;  %v3036_v37 = vadd.f32 %v3020_v32, %v2988_v34  ;;  %v3053_v50 = vsub.f32 %v3471_v40, %v2893_v26  ;;  %3232 = vst [vmem:[%s4752_s4 + $0x68] sm:$0xff] %v3155_v2  ;;  %v2846_v11 = vadd.f32 %v3441_v60, %v3440_v4 }
 0x282   : > { %v2925_v5 = vmul.f32 %v2909_v9, %v2909_v9  ;;  %v2973_v17 = vmul.f32 %v2957_v8, %v2957_v8  ;;  %vm3158_vm15 = vcmp.eq.f32.partialorder %v5021_v43, inf  ;;  %v3473_v21 = vadd.f32 %v4902_v48, %v4741_v36 }
 0x283   : > { %3827 = vrsqrt.f32 %v5050_v56  ;;  %v3826_v25 = vpop.eup %3825  ;;  %v3084_v57 = vadd.f32 %v3068_v59, %v3036_v37  ;;  %v3021_v20 = vmul.f32 %v3005_v23, %v3005_v23  ;;  %v2862_v19 = vadd.f32 %v3472_v0, %v2846_v11 }
 0x284   : > { %v2989_v38 = vadd.f32 %v2973_v17, %v2925_v5  ;;  %v3157_v55 = vmul.f32 %v3826_v25, %v5021_v43  ;;  %vm3160_vm0 = vcmp.eq.f32.partialorder %v5021_v43, 0.0  ;;  %v3442_v15 = vadd.f32 %v4917_v3, %v4733_v52 }
 0x285   : > { %v3443_v40 = vadd.f32 %v4924_v53, %v4735_v54  ;;  %v3161_v10 = vand.u32 2147483648, %v5021_v43  ;;  %v5064_v33 = vmul.f32 0.33333334, %v3084_v57  ;;  %v2878_v18 = vadd.f32 %v3473_v21, %v2862_v19 }
 0x286   : > { %v3037_v48 = vadd.f32 %v3021_v20, %v2989_v38  ;;  %v3159_v12 = vsel %vm3158_vm15, %v5021_v43, %v3157_v55  ;;  %vm3165_vm1 = vcmp.eq.f32.partialorder %v5050_v56, inf  ;;  %v3069_v24 = vmul.f32 %v3053_v50, %v3053_v50 }
 0x287   : > { %v3474_v28 = vadd.f32 %v4919_v27, %v4737_v6  ;;  %v2847_v3 = vadd.f32 %v3443_v40, %v3442_v15  ;;  %v3162_v58 = vsel %vm3160_vm0, %v3161_v10, %v3159_v12  ;;  %vm3167_vm2 = vcmp.eq.f32.partialorder %v5050_v56, 0.0 }
 0x288   : > { %3829 = vrsqrt.f32 %v5064_v33  ;;  %v3444_v53 = vadd.f32 %v4942_v31, %v4733_v52  ;;  %3234 = vst [vmem:[%s4752_s4 + $0x78] sm:$0xff] %v3162_v58  ;;  %v3168_v14 = vand.u32 2147483648, %v5050_v56  ;;  %v3085_v43 = vadd.f32 %v3069_v24, %v3037_v48 }
 0x289   : > { %v2894_v46 = vmul.f32 0.25, %v2878_v18  ;;  %v2863_v39 = vadd.f32 %v3474_v28, %v2847_v3  ;;  %v3475_v16 = vadd.f32 %v4926_v13, %v4741_v36  ;;  %v3476_v27 = vadd.f32 %v4944_v51, %v4737_v6 }
 0x28a   : > { %v3445_v29 = vadd.f32 %v4950_v61, %v4735_v54  ;;  %v5086_v30 = vadd.f32 %v4971_v45, %v4733_v52  ;;  %v5088_v31 = vmul.f32 0.33333334, %v3085_v43  ;;  %v5093_v13 = vadd.f32 %v4980_v49, %v4735_v54 }
 0x28b   : > { %v2910_v42 = vsub.f32 %v3440_v4, %v2894_v46  ;;  %v2958_v26 = vsub.f32 %v3441_v60, %v2894_v46  ;;  %v3006_v41 = vsub.f32 %v3472_v0, %v2894_v46  ;;  %3241 = vst [vmem:[%s4752_s4 + $0xb0] sm:$0xff] %v2894_v46  ;;  %v3054_v34 = vsub.f32 %v3473_v21, %v2894_v46 }
 0x28c   : > { %v2879_v32 = vadd.f32 %v3475_v16, %v2863_v39  ;;  %v2848_v44 = vadd.f32 %v3445_v29, %v3444_v53  ;;  %vm3172_vm3 = vcmp.eq.f32.partialorder %v5064_v33, inf  ;;  %vm3174_vm4 = vcmp.eq.f32.partialorder %v5064_v33, 0.0 }
 0x28d   : > { %v3828_v51 = vpop.eup %3827  ;;  %3831 = vrsqrt.f32 %v5088_v31  ;;  %v3477_v61 = vadd.f32 %v4952_v62, %v4741_v36  ;;  %v2926_v4 = vmul.f32 %v2910_v42, %v2910_v42  ;;  %v2974_v0 = vmul.f32 %v2958_v26, %v2958_v26 }
 0x28e   : > { %v3164_v45 = vmul.f32 %v3828_v51, %v5050_v56  ;;  %v3478_v49 = vadd.f32 %v4973_v22, %v4737_v6  ;;  %v3022_v60 = vmul.f32 %v3006_v41, %v3006_v41  ;;  %v2895_v9 = vmul.f32 0.25, %v2879_v32 }
 0x28f   : > { %v2864_v8 = vadd.f32 %v3476_v27, %v2848_v44  ;;  %v2849_v23 = vadd.f32 %v5093_v13, %v5086_v30  ;;  %v2990_v62 = vadd.f32 %v2974_v0, %v2926_v4  ;;  %v3070_v37 = vmul.f32 %v3054_v34, %v3054_v34 }
 0x290   : > { %v3166_v2 = vsel %vm3165_vm1, %v5050_v56, %v3164_v45  ;;  %v3479_v50 = vadd.f32 %v4982_v35, %v4741_v36  ;;  %v2911_v5 = vsub.f32 %v3442_v15, %v2895_v9  ;;  %v2959_v22 = vsub.f32 %v3443_v40, %v2895_v9  ;;  %3243 = vst [vmem:[%s4752_s4 + $0xc0] sm:$0xff] %v2895_v9 }
 0x291   : > { %v3169_v59 = vsel %vm3167_vm2, %v3168_v14, %v3166_v2  ;;  %v3007_v17 = vsub.f32 %v3474_v28, %v2895_v9  ;;  %v3038_v21 = vadd.f32 %v3022_v60, %v2990_v62  ;;  %v3055_v25 = vsub.f32 %v3475_v16, %v2895_v9 }
 0x292   : > { %v3830_v11 = vpop.eup %3829  ;;  %3236 = vst [vmem:[%s4752_s4 + $0x88] sm:$0xff] %v3169_v59  ;;  %v2880_v57 = vadd.f32 %v3477_v61, %v2864_v8  ;;  %v2865_v38 = vadd.f32 %v3478_v49, %v2849_v23  ;;  %v3175_v19 = vand.u32 2147483648, %v5064_v33  ;;  %v2927_v55 = vmul.f32 %v2911_v5, %v2911_v5 }
 0x293   : > { %v3171_v20 = vmul.f32 %v3830_v11, %v5064_v33  ;;  %v2975_v35 = vmul.f32 %v2959_v22, %v2959_v22  ;;  %vm3179_vm5 = vcmp.eq.f32.partialorder %v5088_v31, inf  ;;  %v3086_v56 = vadd.f32 %v3070_v37, %v3038_v21 }
 0x294   : > { %v2896_v15 = vmul.f32 0.25, %v2880_v57  ;;  %v2881_v40 = vadd.f32 %v3479_v50, %v2865_v38  ;;  %v3023_v18 = vmul.f32 %v3007_v17, %v3007_v17  ;;  %v3071_v12 = vmul.f32 %v3055_v25, %v3055_v25 }
 0x295   : > { %v3173_v10 = vsel %vm3172_vm3, %v5064_v33, %v3171_v20  ;;  %v2991_v48 = vadd.f32 %v2975_v35, %v2927_v55  ;;  %v3102_v28 = vmul.f32 0.33333334, %v3086_v56  ;;  %v3448_v26 = vadd.f32 %v4996_v63, %v4733_v52 }
 0x296   : > { %v3176_v24 = vsel %vm3174_vm4, %v3175_v19, %v3173_v10  ;;  %v2912_v3 = vsub.f32 %v3444_v53, %v2896_v15  ;;  %v2960_v58 = vsub.f32 %v3445_v29, %v2896_v15  ;;  %3245 = vst [vmem:[%s4752_s4 + $0xd0] sm:$0xff] %v2896_v15  ;;  %v3008_v46 = vsub.f32 %v3476_v27, %v2896_v15 }
 0x297   : > { %v3832_v14 = vpop.eup %3831  ;;  %3238 = vst [vmem:[%s4752_s4 + $0x98] sm:$0xff] %v3176_v24  ;;  %v3039_v43 = vadd.f32 %v3023_v18, %v2991_v48  ;;  %v3056_v39 = vsub.f32 %v3477_v61, %v2896_v15  ;;  %v2897_v16 = vmul.f32 0.25, %v2881_v40  ;;  %3833 = vrsqrt.f32 %v3102_v28 }
 0x298   : > { %v3178_v42 = vmul.f32 %v3832_v14, %v5088_v31  ;;  %v3449_v33 = vadd.f32 %v5003_v47, %v4735_v54  ;;  %v3182_v53 = vand.u32 2147483648, %v5088_v31  ;;  %v2928_v41 = vmul.f32 %v2912_v3, %v2912_v3 }
 0x299   : > { %v3087_v29 = vadd.f32 %v3071_v12, %v3039_v43  ;;  %v2976_v34 = vmul.f32 %v2960_v58, %v2960_v58  ;;  %3247 = vst [vmem:[%s4752_s4 + $0xe0] sm:$0xff] %v2897_v16  ;;  %vm3181_vm6 = vcmp.eq.f32.partialorder %v5088_v31, 0.0  ;;  %v3024_v32 = vmul.f32 %v3008_v46, %v3008_v46 }
 0x29a   : > { %v3180_v27 = vsel %vm3179_vm5, %v5088_v31, %v3178_v42  ;;  %v2913_v44 = vsub.f32 %v5086_v30, %v2897_v16  ;;  %v2961_v54 = vsub.f32 %v5093_v13, %v2897_v16  ;;  %v3009_v61 = vsub.f32 %v3478_v49, %v2897_v16 }
 0x29b   : > { %v3183_v51 = vsel %vm3181_vm6, %v3182_v53, %v3180_v27  ;;  %v3103_v52 = vmul.f32 0.33333334, %v3087_v29  ;;  %v2992_v63 = vadd.f32 %v2976_v34, %v2928_v41  ;;  %v3057_v45 = vsub.f32 %v3479_v50, %v2897_v16 }
 0x29c   : > { %3240 = vst [vmem:[%s4752_s4 + $0xa8] sm:$0xff] %v3183_v51  ;;  %v2929_v47 = vmul.f32 %v2913_v44, %v2913_v44  ;;  %v2850_v4 = vadd.f32 %v3449_v33, %v3448_v26  ;;  %v3480_v0 = vadd.f32 %v4998_v1, %v4737_v6  ;;  %v3072_v9 = vmul.f32 %v3056_v39, %v3056_v39 }
 0x29d   : > { %3835 = vrsqrt.f32 %v3103_v52  ;;  %v3040_v60 = vadd.f32 %v3024_v32, %v2992_v63  ;;  %v2977_v31 = vmul.f32 %v2961_v54, %v2961_v54  ;;  %v3481_v30 = vadd.f32 %v5005_v7, %v4741_v36 }
 0x29e   : > { %v2866_v8 = vadd.f32 %v3480_v0, %v2850_v4  ;;  %v3025_v62 = vmul.f32 %v3009_v61, %v3009_v61  ;;  %v3073_v5 = vmul.f32 %v3057_v45, %v3057_v45  ;;  %vm3186_vm7 = vcmp.eq.f32.partialorder %v3102_v28, inf }
 0x29f   : > { %v3088_v23 = vadd.f32 %v3072_v9, %v3040_v60  ;;  %v2993_v2 = vadd.f32 %v2977_v31, %v2929_v47  ;;  %vm3188_vm8 = vcmp.eq.f32.partialorder %v3102_v28, 0.0  ;;  %v3189_v6 = vand.u32 2147483648, %v3102_v28 }
 0x2a0   : > { %v2882_v13 = vadd.f32 %v3481_v30, %v2866_v8  ;;  %vm3193_vm9 = vcmp.eq.f32.partialorder %v3103_v52, inf  ;;  %v3196_v35 = vand.u32 2147483648, %v3103_v52  ;;  %vm3195_vm10 = vcmp.eq.f32.partialorder %v3103_v52, 0.0 }
 0x2a1   : > { %v3834_v37 = vpop.eup %3833  ;;  %v3104_v49 = vmul.f32 0.33333334, %v3088_v23  ;;  %v3041_v50 = vadd.f32 %v3025_v62, %v2993_v2 }
 0x2a2   : > { %v3185_v59 = vmul.f32 %v3834_v37, %v3102_v28  ;;  %v2898_v22 = vmul.f32 0.25, %v2882_v13 }
 0x2a3   : > { %3837 = vrsqrt.f32 %v3104_v49  ;;  %v3089_v17 = vadd.f32 %v3073_v5, %v3041_v50  ;;  %vm3200_vm11 = vcmp.eq.f32.partialorder %v3104_v49, inf  ;;  %v3203_v3 = vand.u32 2147483648, %v3104_v49 }
 0x2a4   : > { %v3187_v1 = vsel %vm3186_vm7, %v3102_v28, %v3185_v59  ;;  %v2914_v36 = vsub.f32 %v3448_v26, %v2898_v22  ;;  %v2962_v7 = vsub.f32 %v3449_v33, %v2898_v22  ;;  %3249 = vst [vmem:[%s4752_s4 + $0xf0] sm:$0xff] %v2898_v22  ;;  %v3010_v21 = vsub.f32 %v3480_v0, %v2898_v22 }
 0x2a5   : > { %v3190_v11 = vsel %vm3188_vm8, %v3189_v6, %v3187_v1  ;;  %v3058_v25 = vsub.f32 %v3481_v30, %v2898_v22  ;;  %v3105_v38 = vmul.f32 0.33333334, %v3089_v17  ;;  %vm3202_vm12 = vcmp.eq.f32.partialorder %v3104_v49, 0.0 }
 0x2a6   : > { %3242 = vst [vmem:[%s4752_s4 + $0xb8] sm:$0xff] %v3190_v11  ;;  %v2930_v20 = vmul.f32 %v2914_v36, %v2914_v36  ;;  %v2978_v19 = vmul.f32 %v2962_v7, %v2962_v7  ;;  %v3026_v40 = vmul.f32 %v3010_v21, %v3010_v21 }
 0x2a7   : > { %v3836_v57 = vpop.eup %3835  ;;  %3839 = vrsqrt.f32 %v3105_v38  ;;  %v3074_v18 = vmul.f32 %v3058_v25, %v3058_v25  ;;  %vm3207_vm13 = vcmp.eq.f32.partialorder %v3105_v38, inf  ;;  %v3210_v16 = vand.u32 2147483648, %v3105_v38 }
 0x2a8   : > { %v3192_v55 = vmul.f32 %v3836_v57, %v3103_v52  ;;  %v2994_v15 = vadd.f32 %v2978_v19, %v2930_v20  ;;  %vm3209_vm14 = vcmp.eq.f32.partialorder %v3105_v38, 0.0 }
 0x2aa   : > { %v3194_v56 = vsel %vm3193_vm9, %v3103_v52, %v3192_v55  ;;  %v3042_v48 = vadd.f32 %v3026_v40, %v2994_v15 }
 0x2ab   : > { %v3197_v10 = vsel %vm3195_vm10, %v3196_v35, %v3194_v56 }
 0x2ac   : > { %3244 = vst [vmem:[%s4752_s4 + $0xc8] sm:$0xff] %v3197_v10  ;;  %v3090_v24 = vadd.f32 %v3074_v18, %v3042_v48 }
 0x2ad   : > { %v3838_v12 = vpop.eup %3837 }
 0x2ae   : > { %v3199_v28 = vmul.f32 %v3838_v12, %v3104_v49  ;;  %v3106_v58 = vmul.f32 0.33333334, %v3090_v24 }
 0x2b0   : > { %v3201_v14 = vsel %vm3200_vm11, %v3104_v49, %v3199_v28  ;;  %3841 = vrsqrt.f32 %v3106_v58  ;;  %vm3214_vm15 = vcmp.eq.f32.partialorder %v3106_v58, inf  ;;  %v3217_v29 = vand.u32 2147483648, %v3106_v58 }
 0x2b1   : > { %v3204_v43 = vsel %vm3202_vm12, %v3203_v3, %v3201_v14  ;;  %v3840_v46 = vpop.eup %3839  ;;  %vm3216_vm0 = vcmp.eq.f32.partialorder %v3106_v58, 0.0 }
 0x2b2   : > { %3246 = vst [vmem:[%s4752_s4 + $0xd8] sm:$0xff] %v3204_v43  ;;  %v3206_v39 = vmul.f32 %v3840_v46, %v3105_v38 }
 0x2b4   : > { %v3208_v42 = vsel %vm3207_vm13, %v3105_v38, %v3206_v39 }
 0x2b5   : > { %v3211_v26 = vsel %vm3209_vm14, %v3210_v16, %v3208_v42 }
 0x2b6   : > { %3248 = vst [vmem:[%s4752_s4 + $0xe8] sm:$0xff] %v3211_v26 }
 0x2ba   : > { %v3842_v33 = vpop.eup %3841 }
 0x2bb   : > { %v3213_v53 = vmul.f32 %v3842_v33, %v3106_v58 }
 0x2bd   : > { %v3215_v41 = vsel %vm3214_vm15, %v3106_v58, %v3213_v53 }
 0x2be   : > { %v3218_v34 = vsel %vm3216_vm0, %v3217_v29, %v3215_v41 }
 0x2bf   : > { %3250 = vst [vmem:[%s4752_s4 + $0xf8] sm:$0xff] %v3218_v34 }
 0x2c0 PF: > { %s13_s12 = sadd.s32 1, %s3849_s12  }
 0x2c1   : > { %p10_p4 = scmp.ge.s32.totalorder %s13_s12, 4  }
 0x2c3   :  { %12 = sbr.rel (!%p10_p4) target bundleno = 1 (0x1), region = 62 }

</bundles_post_ra>
